<compile_context>
chip_gen: v7x
topology: tpu7x:2x2x1
jax: 0.10.0
libtpu: 0.0.40
codegen_flags: <defaults>
</compile_context>

<pallas_src>
import functools

import numpy as np
import jax
import jax.numpy as jnp
from jax import lax
from jax.experimental import pallas as pl
from jax.experimental.pallas import tpu as pltpu


# ----------------------------------------------------------------------------
# Math helpers (usable both inside the kernel and in the pure-JAX reference)
# ----------------------------------------------------------------------------
def _erf(x):
    # Abramowitz & Stegun 7.1.26 polynomial approximation, |err| < 1.5e-7.
    # TODO(synk): PyTorch nn.GELU() uses exact erf; Mosaic support for lax.erf is
    # uncertain, so we use this high-accuracy polynomial (matches to ~1e-7).
    a1, a2, a3, a4, a5 = 0.254829592, -0.284496736, 1.421413741, -1.453152027, 1.061405429
    p = 0.3275911
    sgn = jnp.where(x >= 0, 1.0, -1.0)
    ax = jnp.abs(x)
    t = 1.0 / (1.0 + p * ax)
    poly = ((((a5 * t + a4) * t + a3) * t + a2) * t + a1) * t
    y = 1.0 - poly * jnp.exp(-ax * ax)
    return sgn * y


def _gelu(x):
    # Keep f32 everywhere (v5e has no bf16 VPU/EUP).
    return 0.5 * x * (1.0 + _erf(x * np.float32(1.0 / np.sqrt(2.0))))


# ----------------------------------------------------------------------------
# Fused kernel: score predictor + perturbed top-k + gather/einsum/concat
# ----------------------------------------------------------------------------
def _fused_kernel(cls_ref,                           # scalar-prefetch: (B,) cls positions
                  x_ref, mask_ref, noise_ref, tril_ref,
                  gamma_ref, beta_ref, w1_ref, b1_ref, w2a_ref, w2b_ref, w3_ref,
                  out_ref, wps_ref,
                  *, k, sigma, num_samples):
    f32 = jnp.float32
    b = pl.program_id(0)
    cls = cls_ref[b]

    x = x_ref[...]                                    # (N, D)
    n_tok = x.shape[0]

    # ---- TextPredictorLG: LayerNorm -> Linear(D, C) -> GELU ----
    mean = jnp.mean(x, axis=-1, keepdims=True)
    var = jnp.mean(jnp.square(x - mean), axis=-1, keepdims=True)
    xn = (x - mean) * lax.rsqrt(var + 1e-5)
    xn = xn * gamma_ref[...] + beta_ref[...]          # (N, D)

    h = _gelu(jnp.dot(xn, w1_ref[...], preferred_element_type=f32)
              + b1_ref[...])                          # (N, C) local features

    # cls one-hot column (N, 1): drives the global-feature gather (and later the
    # cls row of the output matmul).  No scratch round-trip, no dynamic slice.
    onehot_col = (lax.broadcasted_iota(jnp.int32, (n_tok, 1), 0) == cls).astype(f32)
    g = lax.dot_general(onehot_col, h, (((0,), (0,)), ((), ())),
                        preferred_element_type=f32)   # (1, C) global feature

    # out_conv Linear(2C, C) on cat([local, global]) == h @ W2a + g @ W2b.
    z = _gelu(jnp.dot(h, w2a_ref[...], preferred_element_type=f32)
              + jnp.dot(g, w2b_ref[...], preferred_element_type=f32))   # (N, C)

    # Score column (N, 1): natural layout for lane-broadcast against (N, S) noise.
    s_col = jax.nn.sigmoid(jnp.dot(z, w3_ref[...], preferred_element_type=f32))
    s_col = s_col * mask_ref[...]                     # masked word scores (N, 1)
    wps_ref[...] = s_col                              # tiny (N,1) store; squeezed in wrapper

    # ---- PerturbedTopK in (N, S) layout: tokens on sublanes, samples on lanes ----
    noise = noise_ref[...]                            # (N, S_pad) f32
    s_pad = noise.shape[1]
    pert = s_col + f32(sigma) * noise                 # (N, S_pad)
    row = lax.broadcasted_iota(jnp.int32, (n_tok, s_pad), 0).astype(f32)   # token idx per row
    # Lane validity mask: padded sample columns are excluded from the mean.
    valid = (lax.broadcasted_iota(jnp.int32, (1, s_pad), 1)
             < num_samples).astype(f32)               # (1, S_pad)

    m = jnp.zeros((n_tok, s_pad), f32)
    for _ in range(k):                                # k is small & static
        col_max = jnp.max(pert, axis=0, keepdims=True)            # (1, S) sublane reduce
        cand = jnp.where(pert == col_max, row, f32(n_tok))
        sel_i = jnp.min(cand, axis=0, keepdims=True)               # lowest index on ties
        hit = (row == sel_i).astype(f32)                           # (N, S) one-hot per sample
        m = m + hit
        pert = jnp.where(hit > 0.0, -jnp.inf, pert)

    # Rank (1..k) of each selected token in ascending-index order:
    # cum[n, s] = sum_{n' <= n} m[n', s]  ==  tril(N,N) @ m(N,S)  (lane-dense MXU output).
    cum = jnp.dot(tril_ref[...], m, preferred_element_type=f32)    # (N, S)
    selpos = m * cum                                               # values in {0..k}

    # Per-rank indicator columns: lane reduce over samples (valid ones only).
    inv_s = f32(1.0 / num_samples)
    cols = [onehot_col]                                            # row 0 of output = cls row
    for j in range(k):
        is_j = (jnp.abs(selpos - f32(j + 1)) < 0.5).astype(f32) * valid
        cols.append(jnp.sum(is_j, axis=1, keepdims=True) * inv_s)  # (N, 1)
    w_cols = jnp.concatenate(cols, axis=1)                         # (N, 1+k)

    # Single (1+k, N) x (N, D) matmul (expressed as A^T·B), single dense store.
    out = lax.dot_general(w_cols, x, (((0,), (0,)), ((), ())),
                          preferred_element_type=f32)              # (1+k, D)
    out_ref[...] = out.astype(out_ref.dtype)


# ----------------------------------------------------------------------------
# Wrapper
# ----------------------------------------------------------------------------
def text_token_selection(x, input_ids, attention_mask, params, k,
                         noise=None, num_samples=500, sigma=0.05, seed=0):
    """Full forward of TextTokenSelection.

    Returns (output (B, 1+k, D), word_pred_score (B, N)).

    If `noise` is None, Gaussian noise of shape (B, num_samples, N) is drawn in
    the wrapper with jax.random.normal (equivalent to the module's torch.normal);
    otherwise `noise` must be a (B, num_samples, N) array (used for exact
    validation against a reproducible reference).
    """
    B, N, D = x.shape
    C = D // 2
    f32 = jnp.float32
    assert k <= N, "topk k must not exceed the number of tokens N"

    cls_pos = jnp.argmax(input_ids, axis=-1).astype(jnp.int32)          # (B,)
    mask_shift = jnp.concatenate(
        [attention_mask[:, 1:].astype(f32), jnp.zeros((B, 1), f32)], axis=1)
    mask_bn1 = mask_shift[:, :, None]                                   # (B, N, 1)

    # Noise: ship to the kernel in (B, N, S_pad) layout (tokens on sublanes,
    # samples on lanes) with S padded to a multiple of 128 lanes; the padded
    # columns are zero-filled and excluded inside the kernel via a lane mask.
    if noise is None:
        noise = jax.random.normal(jax.random.PRNGKey(seed), (B, num_samples, N), f32)
    else:
        num_samples = int(noise.shape[1])
    s_pad = max(128, ((num_samples + 127) // 128) * 128)
    noise_t = jnp.swapaxes(noise.astype(f32), 1, 2)                     # (B, N, S)
    if s_pad != num_samples:
        noise_t = jnp.pad(noise_t, ((0, 0), (0, 0), (0, s_pad - num_samples)))

    # Lower-triangular ones matrix (hoisted out of the kernel, VMEM-resident).
    tril = (jnp.arange(N)[:, None] >= jnp.arange(N)[None, :]).astype(f32)

    gamma = params["gamma"].reshape(1, D)
    beta = params["beta"].reshape(1, D)
    w1 = params["W1"]                                                   # (D, C)
    b1 = params["b1"].reshape(1, C)
    w2a = params["W2"][:C]                                              # (C, C) local half
    w2b = params["W2"][C:]                                              # (C, C) global half
    w3 = params["W3"].reshape(C, 1)                                     # (C, 1)

    out_shapes = (jax.ShapeDtypeStruct((B, 1 + k, D), f32),
                  jax.ShapeDtypeStruct((B, N, 1), f32))
    out_specs = (pl.BlockSpec((None, 1 + k, D), lambda b, *_: (b, 0, 0)),
                 pl.BlockSpec((None, N, 1), lambda b, *_: (b, 0, 0)))

    const2 = lambda *_: (0, 0)
    in_specs = [
        pl.BlockSpec((None, N, D), lambda b, *_: (b, 0, 0)),            # x
        pl.BlockSpec((None, N, 1), lambda b, *_: (b, 0, 0)),            # shifted mask (column)
        pl.BlockSpec((None, N, s_pad), lambda b, *_: (b, 0, 0)),        # noise (contiguous slab)
        pl.BlockSpec((N, N), const2),                                   # tril
        pl.BlockSpec((1, D), const2),                                   # gamma
        pl.BlockSpec((1, D), const2),                                   # beta
        pl.BlockSpec((D, C), const2),                                   # W1
        pl.BlockSpec((1, C), const2),                                   # b1
        pl.BlockSpec((C, C), const2),                                   # W2 local half
        pl.BlockSpec((C, C), const2),                                   # W2 global half
        pl.BlockSpec((C, 1), const2),                                   # W3
    ]

    kern = functools.partial(_fused_kernel, k=int(k), sigma=float(sigma),
                             num_samples=int(num_samples))
    grid_spec = pltpu.PrefetchScalarGridSpec(
        num_scalar_prefetch=1, grid=(B,),
        in_specs=in_specs, out_specs=out_specs)
    # Batch axis is fully independent -> "parallel".
    cparams = pltpu.CompilerParams(dimension_semantics=("parallel",))

    out, wps = pl.pallas_call(
        kern, out_shape=out_shapes, grid_spec=grid_spec, compiler_params=cparams,
    )(cls_pos, x, mask_bn1, noise_t, tril, gamma, beta, w1, b1, w2a, w2b, w3)

    return out, wps[:, :, 0]


# ----------------------------------------------------------------------------
# Pure-JAX reference (for validation)
# ----------------------------------------------------------------------------
def ref_word_scores(x, input_ids, attention_mask, p):
    B, N, D = x.shape
    mean = x.mean(-1, keepdims=True)
    var = jnp.mean(jnp.square(x - mean), -1, keepdims=True)
    xn = (x - mean) * lax.rsqrt(var + 1e-5) * p["gamma"] + p["beta"]
    h = _gelu(xn @ p["W1"] + p["b1"])
    cls_pos = jnp.argmax(input_ids, -1)
    g = h[jnp.arange(B), cls_pos][:, None, :]
    cat = jnp.concatenate([h, jnp.broadcast_to(g, h.shape)], axis=-1)
    z = _gelu(cat @ p["W2"])
    s = jax.nn.sigmoid(z @ p["W3"])[..., 0]
    mask_new = jnp.concatenate(
        [attention_mask[:, 1:], jnp.zeros((B, 1), attention_mask.dtype)], axis=1)
    return s * mask_new


def ref_select(x, input_ids, word_pred_score, noise, k, sigma):
    B, N, D = x.shape
    pert = word_pred_score[:, None, :] + noise * sigma
    _, idx = lax.top_k(pert, k)
    idx = jnp.sort(idx, axis=-1)
    onehot = jax.nn.one_hot(idx, N, dtype=jnp.float32)       # (B, S, k, N)
    indicator = onehot.mean(axis=1)                          # (B, k, N)
    cls_pos = jnp.argmax(input_ids, -1)
    cls_x = x[jnp.arange(B), cls_pos][:, None, :]
    sel = jnp.einsum('bkl,bld->bkd', indicator, x)
    return jnp.concatenate([cls_x, sel], axis=1)


# ----------------------------------------------------------------------------
# Deterministic parameter init (shapes from TextPredictorLG.__init__)
# ----------------------------------------------------------------------------
def init_params(key, D):
    C = D // 2
    ks = jax.random.split(key, 6)
    return {
        "gamma": 1.0 + 0.1 * jax.random.normal(ks[0], (D,), jnp.float32),
        "beta": 0.1 * jax.random.normal(ks[1], (D,), jnp.float32),
        "W1": jax.random.normal(ks[2], (D, C), jnp.float32) / np.sqrt(D),
        "b1": 0.1 * jax.random.normal(ks[3], (C,), jnp.float32),
        "W2": jax.random.normal(ks[4], (D, C), jnp.float32) / np.sqrt(D),   # no bias
        "W3": jax.random.normal(ks[5], (C, 1), jnp.float32) / np.sqrt(C),   # no bias
    }


if __name__ == "__main__":
    B, N, D = 2, 8, 32
    K_TOP = 2
    NUM_SAMPLES = 500     # PerturbedTopK default (padded to 512 lanes internally)
    SIGMA = 0.05          # PerturbedTopK default

    key = jax.random.PRNGKey(0)
    k_x, k_ids, k_noise, k_par = jax.random.split(key, 4)

    x = jax.random.normal(k_x, (B, N, D), jnp.float32)
    input_ids = jax.random.randint(k_ids, (B, N), 1, 1000).astype(jnp.int32)
    cls_positions = jnp.array([0, 3], jnp.int32)              # cls token id is the max
    input_ids = input_ids.at[jnp.arange(B), cls_positions].set(10000)
    attention_mask = jnp.array(
        [[1, 1, 1, 1, 1, 1, 0, 0],
         [1, 1, 1, 1, 0, 0, 0, 0]], jnp.float32)
    # Externally supplied noise (torch.normal's RNG stream is not reproducible in
    # JAX); used for exact validation against the pure-JAX reference.
    # NOTE: masked (padded) tokens get score 0, not -inf, so with noise they can
    # be selected — this matches the reference PyTorch implementation.
    noise = jax.random.normal(k_noise, (B, NUM_SAMPLES, N), jnp.float32)

    params = init_params(k_par, D)

    # ---- Path 1: external noise (checked against the reference) ----
    out, wps = text_token_selection(x, input_ids, attention_mask, params, K_TOP,
                                    noise=noise, sigma=SIGMA)
    out = jax.block_until_ready(out)
    wps = jax.block_until_ready(wps)

    wps_ref = ref_word_scores(x, input_ids, attention_mask, params)
    np.testing.assert_allclose(np.asarray(wps), np.asarray(wps_ref),
                               rtol=1e-4, atol=1e-5)
    # Feed the kernel's own scores to the reference top-k so near-tie flips from
    # sub-ulp score differences cannot cause spurious mismatches.
    out_ref = ref_select(x, input_ids, wps, noise, K_TOP, SIGMA)
    np.testing.assert_allclose(np.asarray(out), np.asarray(out_ref),
                               rtol=1e-4, atol=1e-5)
    assert out.shape == (B, 1 + K_TOP, D)

    # ---- Path 2: wrapper-generated noise, sigma=0 -> must equal hard top-k ----
    out_det, wps_det = text_token_selection(x, input_ids, attention_mask, params,
                                            K_TOP, noise=None, num_samples=64,
                                            sigma=0.0, seed=123)
    out_det = jax.block_until_ready(out_det)
    np.testing.assert_allclose(np.asarray(wps_det), np.asarray(wps),
                               rtol=1e-4, atol=1e-5)
    zero_noise = jnp.zeros((B, 1, N), jnp.float32)
    out_det_ref = ref_select(x, input_ids, wps_det, zero_noise, K_TOP, 0.0)
    np.testing.assert_allclose(np.asarray(out_det), np.asarray(out_det_ref),
                               rtol=1e-4, atol=1e-5)

    # ---- Path 3: wrapper-generated noise at nominal sigma (smoke check) ----
    out_prng, _ = text_token_selection(x, input_ids, attention_mask, params, K_TOP,
                                       noise=None, num_samples=NUM_SAMPLES,
                                       sigma=SIGMA, seed=7)
    out_prng = jax.block_until_ready(out_prng)
    assert out_prng.shape == (B, 1 + K_TOP, D)
    assert np.isfinite(np.asarray(out_prng)).all()
    cls_rows = np.asarray(x)[np.arange(B), np.asarray(cls_positions)]
    np.testing.assert_allclose(np.asarray(out_prng)[:, 0, :], cls_rows,
                               rtol=1e-6, atol=1e-6)

    print("KERNEL_OK")
</pallas_src>

<mosaic_0001>
module attributes {stable_mosaic.version = 11 : i64} {
  func.func @_fused_kernel(%arg0: i32, %arg1: memref<2xi32, #tpu.memory_space<smem>>, %arg2: memref<1x8x32xf32, #tpu.memory_space<vmem>>, %arg3: memref<1x8x1xf32, #tpu.memory_space<vmem>>, %arg4: memref<1x8x512xf32, #tpu.memory_space<vmem>>, %arg5: memref<8x8xf32, #tpu.memory_space<vmem>>, %arg6: memref<1x32xf32, #tpu.memory_space<vmem>>, %arg7: memref<1x32xf32, #tpu.memory_space<vmem>>, %arg8: memref<32x16xf32, #tpu.memory_space<vmem>>, %arg9: memref<1x16xf32, #tpu.memory_space<vmem>>, %arg10: memref<16x16xf32, #tpu.memory_space<vmem>>, %arg11: memref<16x16xf32, #tpu.memory_space<vmem>>, %arg12: memref<16x1xf32, #tpu.memory_space<vmem>>, %arg13: memref<1x3x32xf32, #tpu.memory_space<vmem>>, %arg14: memref<1x8x1xf32, #tpu.memory_space<vmem>>) attributes {dimension_semantics = [#tpu.dimension_semantics<parallel>], iteration_bounds = array<i64: 2>, scalar_prefetch = 1 : i64, scratch_operands = 0 : i64, tpu.core_type = #tpu.core_type<tc>, window_params = [{transform_indices = @transform_0, window_bounds = array<i64: 1, 8, 32>}, {transform_indices = @transform_1, window_bounds = array<i64: 1, 8, 1>}, {transform_indices = @transform_2, window_bounds = array<i64: 1, 8, 512>}, {pipeline_mode = #tpu.pipeline_mode<synchronous>, transform_indices = @transform_3, window_bounds = array<i64: 8, 8>}, {pipeline_mode = #tpu.pipeline_mode<synchronous>, transform_indices = @transform_4, window_bounds = array<i64: 1, 32>}, {pipeline_mode = #tpu.pipeline_mode<synchronous>, transform_indices = @transform_5, window_bounds = array<i64: 1, 32>}, {pipeline_mode = #tpu.pipeline_mode<synchronous>, transform_indices = @transform_6, window_bounds = array<i64: 32, 16>}, {pipeline_mode = #tpu.pipeline_mode<synchronous>, transform_indices = @transform_7, window_bounds = array<i64: 1, 16>}, {pipeline_mode = #tpu.pipeline_mode<synchronous>, transform_indices = @transform_8, window_bounds = array<i64: 16, 16>}, {pipeline_mode = #tpu.pipeline_mode<synchronous>, transform_indices = @transform_9, window_bounds = array<i64: 16, 16>}, {pipeline_mode = #tpu.pipeline_mode<synchronous>, transform_indices = @transform_10, window_bounds = array<i64: 16, 1>}, {transform_indices = @transform_11, window_bounds = array<i64: 1, 3, 32>}, {transform_indices = @transform_12, window_bounds = array<i64: 1, 8, 1>}]} {
    %0 = arith.index_cast %arg0 : i32 to index
    %1 = memref.load %arg1[%0] : memref<2xi32, #tpu.memory_space<smem>>
    %c0 = arith.constant 0 : index
    %c0_0 = arith.constant 0 : index
    %c0_1 = arith.constant 0 : index
    %2 = vector.load %arg2[%c0, %c0_0, %c0_1] : memref<1x8x32xf32, #tpu.memory_space<vmem>>, vector<1x8x32xf32>
    %3 = vector.shape_cast %2 : vector<1x8x32xf32> to vector<8x32xf32>
    %cst = arith.constant dense<0.000000e+00> : vector<8xf32>
    %4 = vector.multi_reduction <add>, %3, %cst [1] : vector<8x32xf32> to vector<8xf32>
    %5 = vector.shape_cast %4 : vector<8xf32> to vector<8x1xf32>
    %cst_2 = arith.constant 3.200000e+01 : f32
    %6 = vector.broadcast %cst_2 : f32 to vector<8x1xf32>
    %7 = arith.divf %5, %6 : vector<8x1xf32>
    %8 = vector.broadcast %7 : vector<8x1xf32> to vector<8x32xf32>
    %9 = arith.subf %3, %8 : vector<8x32xf32>
    %10 = arith.mulf %9, %9 : vector<8x32xf32>
    %cst_3 = arith.constant dense<0.000000e+00> : vector<8xf32>
    %11 = vector.multi_reduction <add>, %10, %cst_3 [1] : vector<8x32xf32> to vector<8xf32>
    %12 = vector.shape_cast %11 : vector<8xf32> to vector<8x1xf32>
    %cst_4 = arith.constant 3.200000e+01 : f32
    %13 = vector.broadcast %cst_4 : f32 to vector<8x1xf32>
    %14 = arith.divf %12, %13 : vector<8x1xf32>
    %15 = vector.broadcast %7 : vector<8x1xf32> to vector<8x32xf32>
    %16 = arith.subf %3, %15 : vector<8x32xf32>
    %cst_5 = arith.constant 9.99999974E-6 : f32
    %17 = vector.broadcast %cst_5 : f32 to vector<8x1xf32>
    %18 = arith.addf %14, %17 : vector<8x1xf32>
    %19 = math.rsqrt %18 : vector<8x1xf32>
    %20 = vector.broadcast %19 : vector<8x1xf32> to vector<8x32xf32>
    %21 = arith.mulf %16, %20 : vector<8x32xf32>
    %c0_6 = arith.constant 0 : index
    %c0_7 = arith.constant 0 : index
    %22 = vector.load %arg6[%c0_6, %c0_7] : memref<1x32xf32, #tpu.memory_space<vmem>>, vector<1x32xf32>
    %23 = vector.broadcast %22 : vector<1x32xf32> to vector<8x32xf32>
    %24 = arith.mulf %21, %23 : vector<8x32xf32>
    %c0_8 = arith.constant 0 : index
    %c0_9 = arith.constant 0 : index
    %25 = vector.load %arg7[%c0_8, %c0_9] : memref<1x32xf32, #tpu.memory_space<vmem>>, vector<1x32xf32>
    %26 = vector.broadcast %25 : vector<1x32xf32> to vector<8x32xf32>
    %27 = arith.addf %24, %26 : vector<8x32xf32>
    %c0_10 = arith.constant 0 : index
    %c0_11 = arith.constant 0 : index
    %28 = vector.load %arg8[%c0_10, %c0_11] : memref<32x16xf32, #tpu.memory_space<vmem>>, vector<32x16xf32>
    %cst_12 = arith.constant dense<0.000000e+00> : vector<8x16xf32>
    %29 = tpu.matmul %27, %28, %cst_12 {dimension_numbers = #tpu.dot_dimension_numbers<[1], [0], [0], [1], [0, 0, 1, 1], [], []>} : vector<8x32xf32>, vector<32x16xf32>, vector<8x16xf32> -> vector<8x16xf32>
    %c0_13 = arith.constant 0 : index
    %c0_14 = arith.constant 0 : index
    %30 = vector.load %arg9[%c0_13, %c0_14] : memref<1x16xf32, #tpu.memory_space<vmem>>, vector<1x16xf32>
    %31 = vector.broadcast %30 : vector<1x16xf32> to vector<8x16xf32>
    %32 = arith.addf %29, %31 : vector<8x16xf32>
    %cst_15 = arith.constant 5.000000e-01 : f32
    %33 = vector.broadcast %cst_15 : f32 to vector<8x16xf32>
    %34 = arith.mulf %33, %32 : vector<8x16xf32>
    %cst_16 = arith.constant 0.707106769 : f32
    %35 = vector.broadcast %cst_16 : f32 to vector<8x16xf32>
    %36 = arith.mulf %32, %35 : vector<8x16xf32>
    %cst_17 = arith.constant 0.000000e+00 : f32
    %37 = vector.broadcast %cst_17 : f32 to vector<8x16xf32>
    %38 = arith.cmpf oge, %36, %37 : vector<8x16xf32>
    %cst_18 = arith.constant 1.000000e+00 : f32
    %cst_19 = arith.constant -1.000000e+00 : f32
    %39 = vector.broadcast %cst_18 : f32 to vector<8x16xf32>
    %40 = vector.broadcast %cst_19 : f32 to vector<8x16xf32>
    %41 = arith.select %38, %39, %40 : vector<8x16xi1>, vector<8x16xf32>
    %42 = math.absf %36 : vector<8x16xf32>
    %cst_20 = arith.constant 0.327591091 : f32
    %43 = vector.broadcast %cst_20 : f32 to vector<8x16xf32>
    %44 = arith.mulf %43, %42 : vector<8x16xf32>
    %cst_21 = arith.constant 1.000000e+00 : f32
    %45 = vector.broadcast %cst_21 : f32 to vector<8x16xf32>
    %46 = arith.addf %45, %44 : vector<8x16xf32>
    %cst_22 = arith.constant 1.000000e+00 : f32
    %47 = vector.broadcast %cst_22 : f32 to vector<8x16xf32>
    %48 = arith.divf %47, %46 : vector<8x16xf32>
    %cst_23 = arith.constant 1.06140542 : f32
    %49 = vector.broadcast %cst_23 : f32 to vector<8x16xf32>
    %50 = arith.mulf %49, %48 : vector<8x16xf32>
    %cst_24 = arith.constant -1.45315206 : f32
    %51 = vector.broadcast %cst_24 : f32 to vector<8x16xf32>
    %52 = arith.addf %50, %51 : vector<8x16xf32>
    %53 = arith.mulf %52, %48 : vector<8x16xf32>
    %cst_25 = arith.constant 1.42141378 : f32
    %54 = vector.broadcast %cst_25 : f32 to vector<8x16xf32>
    %55 = arith.addf %53, %54 : vector<8x16xf32>
    %56 = arith.mulf %55, %48 : vector<8x16xf32>
    %cst_26 = arith.constant -0.284496725 : f32
    %57 = vector.broadcast %cst_26 : f32 to vector<8x16xf32>
    %58 = arith.addf %56, %57 : vector<8x16xf32>
    %59 = arith.mulf %58, %48 : vector<8x16xf32>
    %cst_27 = arith.constant 0.254829586 : f32
    %60 = vector.broadcast %cst_27 : f32 to vector<8x16xf32>
    %61 = arith.addf %59, %60 : vector<8x16xf32>
    %62 = arith.mulf %61, %48 : vector<8x16xf32>
    %cst_28 = arith.constant 0.000000e+00 : f32
    %63 = vector.broadcast %cst_28 : f32 to vector<8x16xf32>
    %64 = arith.subf %63, %42 : vector<8x16xf32>
    %65 = arith.mulf %64, %42 : vector<8x16xf32>
    %66 = math.exp %65 : vector<8x16xf32>
    %67 = arith.mulf %62, %66 : vector<8x16xf32>
    %cst_29 = arith.constant 1.000000e+00 : f32
    %68 = vector.broadcast %cst_29 : f32 to vector<8x16xf32>
    %69 = arith.subf %68, %67 : vector<8x16xf32>
    %70 = arith.mulf %41, %69 : vector<8x16xf32>
    %cst_30 = arith.constant 1.000000e+00 : f32
    %71 = vector.broadcast %cst_30 : f32 to vector<8x16xf32>
    %72 = arith.addf %71, %70 : vector<8x16xf32>
    %73 = arith.mulf %34, %72 : vector<8x16xf32>
    %74 = tpu.iota {dimensions = array<i32: 0>} : vector<8x1xi32>
    %75 = vector.broadcast %1 : i32 to vector<8x1xi32>
    %76 = arith.cmpi eq, %74, %75 : vector<8x1xi32>
    %77 = arith.extui %76 : vector<8x1xi1> to vector<8x1xi32>
    %78 = arith.sitofp %77 : vector<8x1xi32> to vector<8x1xf32>
    %cst_31 = arith.constant dense<0.000000e+00> : vector<1x16xf32>
    %79 = tpu.matmul %78, %73, %cst_31 {dimension_numbers = #tpu.dot_dimension_numbers<[0], [0], [1], [1], [0, 1, 1, 1], [], []>} : vector<8x1xf32>, vector<8x16xf32>, vector<1x16xf32> -> vector<1x16xf32>
    %c0_32 = arith.constant 0 : index
    %c0_33 = arith.constant 0 : index
    %80 = vector.load %arg10[%c0_32, %c0_33] : memref<16x16xf32, #tpu.memory_space<vmem>>, vector<16x16xf32>
    %cst_34 = arith.constant dense<0.000000e+00> : vector<8x16xf32>
    %81 = tpu.matmul %73, %80, %cst_34 {dimension_numbers = #tpu.dot_dimension_numbers<[1], [0], [0], [1], [0, 0, 1, 1], [], []>} : vector<8x16xf32>, vector<16x16xf32>, vector<8x16xf32> -> vector<8x16xf32>
    %c0_35 = arith.constant 0 : index
    %c0_36 = arith.constant 0 : index
    %82 = vector.load %arg11[%c0_35, %c0_36] : memref<16x16xf32, #tpu.memory_space<vmem>>, vector<16x16xf32>
    %cst_37 = arith.constant dense<0.000000e+00> : vector<1x16xf32>
    %83 = tpu.matmul %79, %82, %cst_37 {dimension_numbers = #tpu.dot_dimension_numbers<[1], [0], [0], [1], [0, 0, 1, 1], [], []>} : vector<1x16xf32>, vector<16x16xf32>, vector<1x16xf32> -> vector<1x16xf32>
    %84 = vector.broadcast %83 : vector<1x16xf32> to vector<8x16xf32>
    %85 = arith.addf %81, %84 : vector<8x16xf32>
    %cst_38 = arith.constant 5.000000e-01 : f32
    %86 = vector.broadcast %cst_38 : f32 to vector<8x16xf32>
    %87 = arith.mulf %86, %85 : vector<8x16xf32>
    %cst_39 = arith.constant 0.707106769 : f32
    %88 = vector.broadcast %cst_39 : f32 to vector<8x16xf32>
    %89 = arith.mulf %85, %88 : vector<8x16xf32>
    %cst_40 = arith.constant 0.000000e+00 : f32
    %90 = vector.broadcast %cst_40 : f32 to vector<8x16xf32>
    %91 = arith.cmpf oge, %89, %90 : vector<8x16xf32>
    %cst_41 = arith.constant 1.000000e+00 : f32
    %cst_42 = arith.constant -1.000000e+00 : f32
    %92 = vector.broadcast %cst_41 : f32 to vector<8x16xf32>
    %93 = vector.broadcast %cst_42 : f32 to vector<8x16xf32>
    %94 = arith.select %91, %92, %93 : vector<8x16xi1>, vector<8x16xf32>
    %95 = math.absf %89 : vector<8x16xf32>
    %cst_43 = arith.constant 0.327591091 : f32
    %96 = vector.broadcast %cst_43 : f32 to vector<8x16xf32>
    %97 = arith.mulf %96, %95 : vector<8x16xf32>
    %cst_44 = arith.constant 1.000000e+00 : f32
    %98 = vector.broadcast %cst_44 : f32 to vector<8x16xf32>
    %99 = arith.addf %98, %97 : vector<8x16xf32>
    %cst_45 = arith.constant 1.000000e+00 : f32
    %100 = vector.broadcast %cst_45 : f32 to vector<8x16xf32>
    %101 = arith.divf %100, %99 : vector<8x16xf32>
    %cst_46 = arith.constant 1.06140542 : f32
    %102 = vector.broadcast %cst_46 : f32 to vector<8x16xf32>
    %103 = arith.mulf %102, %101 : vector<8x16xf32>
    %cst_47 = arith.constant -1.45315206 : f32
    %104 = vector.broadcast %cst_47 : f32 to vector<8x16xf32>
    %105 = arith.addf %103, %104 : vector<8x16xf32>
    %106 = arith.mulf %105, %101 : vector<8x16xf32>
    %cst_48 = arith.constant 1.42141378 : f32
    %107 = vector.broadcast %cst_48 : f32 to vector<8x16xf32>
    %108 = arith.addf %106, %107 : vector<8x16xf32>
    %109 = arith.mulf %108, %101 : vector<8x16xf32>
    %cst_49 = arith.constant -0.284496725 : f32
    %110 = vector.broadcast %cst_49 : f32 to vector<8x16xf32>
    %111 = arith.addf %109, %110 : vector<8x16xf32>
    %112 = arith.mulf %111, %101 : vector<8x16xf32>
    %cst_50 = arith.constant 0.254829586 : f32
    %113 = vector.broadcast %cst_50 : f32 to vector<8x16xf32>
    %114 = arith.addf %112, %113 : vector<8x16xf32>
    %115 = arith.mulf %114, %101 : vector<8x16xf32>
    %cst_51 = arith.constant 0.000000e+00 : f32
    %116 = vector.broadcast %cst_51 : f32 to vector<8x16xf32>
    %117 = arith.subf %116, %95 : vector<8x16xf32>
    %118 = arith.mulf %117, %95 : vector<8x16xf32>
    %119 = math.exp %118 : vector<8x16xf32>
    %120 = arith.mulf %115, %119 : vector<8x16xf32>
    %cst_52 = arith.constant 1.000000e+00 : f32
    %121 = vector.broadcast %cst_52 : f32 to vector<8x16xf32>
    %122 = arith.subf %121, %120 : vector<8x16xf32>
    %123 = arith.mulf %94, %122 : vector<8x16xf32>
    %cst_53 = arith.constant 1.000000e+00 : f32
    %124 = vector.broadcast %cst_53 : f32 to vector<8x16xf32>
    %125 = arith.addf %124, %123 : vector<8x16xf32>
    %126 = arith.mulf %87, %125 : vector<8x16xf32>
    %c0_54 = arith.constant 0 : index
    %c0_55 = arith.constant 0 : index
    %127 = vector.load %arg12[%c0_54, %c0_55] : memref<16x1xf32, #tpu.memory_space<vmem>>, vector<16x1xf32>
    %cst_56 = arith.constant dense<0.000000e+00> : vector<8x1xf32>
    %128 = tpu.matmul %126, %127, %cst_56 {dimension_numbers = #tpu.dot_dimension_numbers<[1], [0], [0], [1], [0, 0, 1, 1], [], []>} : vector<8x16xf32>, vector<16x1xf32>, vector<8x1xf32> -> vector<8x1xf32>
    %129 = arith.negf %128 : vector<8x1xf32>
    %130 = math.exp %129 : vector<8x1xf32>
    %cst_57 = arith.constant 1.000000e+00 : f32
    %131 = vector.broadcast %cst_57 : f32 to vector<8x1xf32>
    %132 = arith.addf %131, %130 : vector<8x1xf32>
    %133 = arith.divf %131, %132 : vector<8x1xf32>
    %c0_58 = arith.constant 0 : index
    %c0_59 = arith.constant 0 : index
    %c0_60 = arith.constant 0 : index
    %134 = vector.load %arg3[%c0_58, %c0_59, %c0_60] : memref<1x8x1xf32, #tpu.memory_space<vmem>>, vector<1x8x1xf32>
    %135 = vector.shape_cast %134 : vector<1x8x1xf32> to vector<8x1xf32>
    %136 = arith.mulf %133, %135 : vector<8x1xf32>
    %c0_61 = arith.constant 0 : index
    %c0_62 = arith.constant 0 : index
    %c0_63 = arith.constant 0 : index
    %137 = vector.load %arg14[%c0_61, %c0_62, %c0_63] : memref<1x8x1xf32, #tpu.memory_space<vmem>>, vector<1x8x1xf32>
    %138 = vector.shape_cast %137 : vector<1x8x1xf32> to vector<8x1xf32>
    %139 = vector.shape_cast %136 : vector<8x1xf32> to vector<1x8x1xf32>
    tpu.vector_store %arg14[%c0_61, %c0_62, %c0_63], %139 {strides = array<i32>} : memref<1x8x1xf32, #tpu.memory_space<vmem>>, vector<1x8x1xf32>,
    %c0_64 = arith.constant 0 : index
    %c0_65 = arith.constant 0 : index
    %c0_66 = arith.constant 0 : index
    %140 = vector.load %arg4[%c0_64, %c0_65, %c0_66] : memref<1x8x512xf32, #tpu.memory_space<vmem>>, vector<1x8x512xf32>
    %141 = vector.shape_cast %140 : vector<1x8x512xf32> to vector<8x512xf32>
    %cst_67 = arith.constant 5.000000e-02 : f32
    %142 = vector.broadcast %cst_67 : f32 to vector<8x512xf32>
    %143 = arith.mulf %142, %141 : vector<8x512xf32>
    %144 = vector.broadcast %136 : vector<8x1xf32> to vector<8x512xf32>
    %145 = arith.addf %144, %143 : vector<8x512xf32>
    %146 = tpu.iota {dimensions = array<i32: 0>} : vector<8x512xi32>
    %147 = arith.sitofp %146 : vector<8x512xi32> to vector<8x512xf32>
    %148 = tpu.iota {dimensions = array<i32: 1>} : vector<1x512xi32>
    %c500_i32 = arith.constant 500 : i32
    %149 = vector.broadcast %c500_i32 : i32 to vector<1x512xi32>
    %150 = arith.cmpi slt, %148, %149 : vector<1x512xi32>
    %151 = arith.extui %150 : vector<1x512xi1> to vector<1x512xi32>
    %152 = arith.sitofp %151 : vector<1x512xi32> to vector<1x512xf32>
    %cst_68 = arith.constant 0.000000e+00 : f32
    %153 = vector.broadcast %cst_68 : f32 to vector<8x512xf32>
    %cst_69 = arith.constant dense<0xFF800000> : vector<512xf32>
    %154 = vector.multi_reduction <maximumf>, %145, %cst_69 [0] : vector<8x512xf32> to vector<512xf32>
    %155 = vector.shape_cast %154 : vector<512xf32> to vector<1x512xf32>
    %156 = vector.broadcast %155 : vector<1x512xf32> to vector<8x512xf32>
    %157 = arith.cmpf oeq, %145, %156 : vector<8x512xf32>
    %cst_70 = arith.constant 8.000000e+00 : f32
    %158 = vector.broadcast %cst_70 : f32 to vector<8x512xf32>
    %159 = arith.select %157, %147, %158 : vector<8x512xi1>, vector<8x512xf32>
    %cst_71 = arith.constant dense<0x7F800000> : vector<512xf32>
    %160 = vector.multi_reduction <minimumf>, %159, %cst_71 [0] : vector<8x512xf32> to vector<512xf32>
    %161 = vector.shape_cast %160 : vector<512xf32> to vector<1x512xf32>
    %162 = vector.broadcast %161 : vector<1x512xf32> to vector<8x512xf32>
    %163 = arith.cmpf oeq, %147, %162 : vector<8x512xf32>
    %164 = arith.extui %163 : vector<8x512xi1> to vector<8x512xi32>
    %165 = arith.sitofp %164 : vector<8x512xi32> to vector<8x512xf32>
    %166 = arith.addf %153, %165 : vector<8x512xf32>
    %cst_72 = arith.constant 0.000000e+00 : f32
    %167 = vector.broadcast %cst_72 : f32 to vector<8x512xf32>
    %168 = arith.cmpf ogt, %165, %167 : vector<8x512xf32>
    %cst_73 = arith.constant 0xFF800000 : f32
    %169 = vector.broadcast %cst_73 : f32 to vector<8x512xf32>
    %170 = arith.select %168, %169, %145 : vector<8x512xi1>, vector<8x512xf32>
    %cst_74 = arith.constant dense<0xFF800000> : vector<512xf32>
    %171 = vector.multi_reduction <maximumf>, %170, %cst_74 [0] : vector<8x512xf32> to vector<512xf32>
    %172 = vector.shape_cast %171 : vector<512xf32> to vector<1x512xf32>
    %173 = vector.broadcast %172 : vector<1x512xf32> to vector<8x512xf32>
    %174 = arith.cmpf oeq, %170, %173 : vector<8x512xf32>
    %cst_75 = arith.constant 8.000000e+00 : f32
    %175 = vector.broadcast %cst_75 : f32 to vector<8x512xf32>
    %176 = arith.select %174, %147, %175 : vector<8x512xi1>, vector<8x512xf32>
    %cst_76 = arith.constant dense<0x7F800000> : vector<512xf32>
    %177 = vector.multi_reduction <minimumf>, %176, %cst_76 [0] : vector<8x512xf32> to vector<512xf32>
    %178 = vector.shape_cast %177 : vector<512xf32> to vector<1x512xf32>
    %179 = vector.broadcast %178 : vector<1x512xf32> to vector<8x512xf32>
    %180 = arith.cmpf oeq, %147, %179 : vector<8x512xf32>
    %181 = arith.extui %180 : vector<8x512xi1> to vector<8x512xi32>
    %182 = arith.sitofp %181 : vector<8x512xi32> to vector<8x512xf32>
    %183 = arith.addf %166, %182 : vector<8x512xf32>
    %c0_77 = arith.constant 0 : index
    %c0_78 = arith.constant 0 : index
    %184 = vector.load %arg5[%c0_77, %c0_78] : memref<8x8xf32, #tpu.memory_space<vmem>>, vector<8x8xf32>
    %cst_79 = arith.constant dense<0.000000e+00> : vector<8x512xf32>
    %185 = tpu.matmul %184, %183, %cst_79 {dimension_numbers = #tpu.dot_dimension_numbers<[1], [0], [0], [1], [0, 0, 1, 1], [], []>} : vector<8x8xf32>, vector<8x512xf32>, vector<8x512xf32> -> vector<8x512xf32>
    %186 = arith.mulf %183, %185 : vector<8x512xf32>
    %cst_80 = arith.constant 1.000000e+00 : f32
    %187 = vector.broadcast %cst_80 : f32 to vector<8x512xf32>
    %188 = arith.subf %186, %187 : vector<8x512xf32>
    %189 = math.absf %188 : vector<8x512xf32>
    %cst_81 = arith.constant 5.000000e-01 : f32
    %190 = vector.broadcast %cst_81 : f32 to vector<8x512xf32>
    %191 = arith.cmpf olt, %189, %190 : vector<8x512xf32>
    %192 = arith.extui %191 : vector<8x512xi1> to vector<8x512xi32>
    %193 = arith.sitofp %192 : vector<8x512xi32> to vector<8x512xf32>
    %194 = vector.broadcast %152 : vector<1x512xf32> to vector<8x512xf32>
    %195 = arith.mulf %193, %194 : vector<8x512xf32>
    %cst_82 = arith.constant dense<0.000000e+00> : vector<8xf32>
    %196 = vector.multi_reduction <add>, %195, %cst_82 [1] : vector<8x512xf32> to vector<8xf32>
    %197 = vector.shape_cast %196 : vector<8xf32> to vector<8x1xf32>
    %cst_83 = arith.constant 2.000000e-03 : f32
    %198 = vector.broadcast %cst_83 : f32 to vector<8x1xf32>
    %199 = arith.mulf %197, %198 : vector<8x1xf32>
    %cst_84 = arith.constant 2.000000e+00 : f32
    %200 = vector.broadcast %cst_84 : f32 to vector<8x512xf32>
    %201 = arith.subf %186, %200 : vector<8x512xf32>
    %202 = math.absf %201 : vector<8x512xf32>
    %cst_85 = arith.constant 5.000000e-01 : f32
    %203 = vector.broadcast %cst_85 : f32 to vector<8x512xf32>
    %204 = arith.cmpf olt, %202, %203 : vector<8x512xf32>
    %205 = arith.extui %204 : vector<8x512xi1> to vector<8x512xi32>
    %206 = arith.sitofp %205 : vector<8x512xi32> to vector<8x512xf32>
    %207 = vector.broadcast %152 : vector<1x512xf32> to vector<8x512xf32>
    %208 = arith.mulf %206, %207 : vector<8x512xf32>
    %cst_86 = arith.constant dense<0.000000e+00> : vector<8xf32>
    %209 = vector.multi_reduction <add>, %208, %cst_86 [1] : vector<8x512xf32> to vector<8xf32>
    %210 = vector.shape_cast %209 : vector<8xf32> to vector<8x1xf32>
    %cst_87 = arith.constant 2.000000e-03 : f32
    %211 = vector.broadcast %cst_87 : f32 to vector<8x1xf32>
    %212 = arith.mulf %210, %211 : vector<8x1xf32>
    %213 = tpu.concatenate %78, %199, %212 in 1 : vector<8x1xf32>, vector<8x1xf32>, vector<8x1xf32> -> vector<8x3xf32>
    %cst_88 = arith.constant dense<0.000000e+00> : vector<3x32xf32>
    %214 = tpu.matmul %213, %3, %cst_88 {dimension_numbers = #tpu.dot_dimension_numbers<[0], [0], [1], [1], [0, 1, 1, 1], [], []>} : vector<8x3xf32>, vector<8x32xf32>, vector<3x32xf32> -> vector<3x32xf32>
    %c0_89 = arith.constant 0 : index
    %c0_90 = arith.constant 0 : index
    %c0_91 = arith.constant 0 : index
    %215 = vector.load %arg13[%c0_89, %c0_90, %c0_91] : memref<1x3x32xf32, #tpu.memory_space<vmem>>, vector<1x3x32xf32>
    %216 = vector.shape_cast %215 : vector<1x3x32xf32> to vector<3x32xf32>
    %217 = vector.shape_cast %214 : vector<3x32xf32> to vector<1x3x32xf32>
    tpu.vector_store %arg13[%c0_89, %c0_90, %c0_91], %217 {strides = array<i32>} : memref<1x3x32xf32, #tpu.memory_space<vmem>>, vector<1x3x32xf32>,
    return
  }
  func.func @transform_0(%arg0: i32, %arg1: memref<2xi32, #tpu.memory_space<smem>>) -> (i32, i32, i32) {
    %c0_i32 = arith.constant 0 : i32
    %c0_i32_0 = arith.constant 0 : i32
    %c0_i32_1 = arith.constant 0 : i32
    return %arg0, %c0_i32, %c0_i32_0 : i32, i32, i32
  }
  func.func @transform_1(%arg0: i32, %arg1: memref<2xi32, #tpu.memory_space<smem>>) -> (i32, i32, i32) {
    %c0_i32 = arith.constant 0 : i32
    %c0_i32_0 = arith.constant 0 : i32
    %c0_i32_1 = arith.constant 0 : i32
    return %arg0, %c0_i32, %c0_i32_0 : i32, i32, i32
  }
  func.func @transform_2(%arg0: i32, %arg1: memref<2xi32, #tpu.memory_space<smem>>) -> (i32, i32, i32) {
    %c0_i32 = arith.constant 0 : i32
    %c0_i32_0 = arith.constant 0 : i32
    %c0_i32_1 = arith.constant 0 : i32
    return %arg0, %c0_i32, %c0_i32_0 : i32, i32, i32
  }
  func.func @transform_3(%arg0: i32, %arg1: memref<2xi32, #tpu.memory_space<smem>>) -> (i32, i32) {
    %c0_i32 = arith.constant 0 : i32
    %c0_i32_0 = arith.constant 0 : i32
    %c0_i32_1 = arith.constant 0 : i32
    return %c0_i32, %c0_i32_0 : i32, i32
  }
  func.func @transform_4(%arg0: i32, %arg1: memref<2xi32, #tpu.memory_space<smem>>) -> (i32, i32) {
    %c0_i32 = arith.constant 0 : i32
    %c0_i32_0 = arith.constant 0 : i32
    %c0_i32_1 = arith.constant 0 : i32
    return %c0_i32, %c0_i32_0 : i32, i32
  }
  func.func @transform_5(%arg0: i32, %arg1: memref<2xi32, #tpu.memory_space<smem>>) -> (i32, i32) {
    %c0_i32 = arith.constant 0 : i32
    %c0_i32_0 = arith.constant 0 : i32
    %c0_i32_1 = arith.constant 0 : i32
    return %c0_i32, %c0_i32_0 : i32, i32
  }
  func.func @transform_6(%arg0: i32, %arg1: memref<2xi32, #tpu.memory_space<smem>>) -> (i32, i32) {
    %c0_i32 = arith.constant 0 : i32
    %c0_i32_0 = arith.constant 0 : i32
    %c0_i32_1 = arith.constant 0 : i32
    return %c0_i32, %c0_i32_0 : i32, i32
  }
  func.func @transform_7(%arg0: i32, %arg1: memref<2xi32, #tpu.memory_space<smem>>) -> (i32, i32) {
    %c0_i32 = arith.constant 0 : i32
    %c0_i32_0 = arith.constant 0 : i32
    %c0_i32_1 = arith.constant 0 : i32
    return %c0_i32, %c0_i32_0 : i32, i32
  }
  func.func @transform_8(%arg0: i32, %arg1: memref<2xi32, #tpu.memory_space<smem>>) -> (i32, i32) {
    %c0_i32 = arith.constant 0 : i32
    %c0_i32_0 = arith.constant 0 : i32
    %c0_i32_1 = arith.constant 0 : i32
    return %c0_i32, %c0_i32_0 : i32, i32
  }
  func.func @transform_9(%arg0: i32, %arg1: memref<2xi32, #tpu.memory_space<smem>>) -> (i32, i32) {
    %c0_i32 = arith.constant 0 : i32
    %c0_i32_0 = arith.constant 0 : i32
    %c0_i32_1 = arith.constant 0 : i32
    return %c0_i32, %c0_i32_0 : i32, i32
  }
  func.func @transform_10(%arg0: i32, %arg1: memref<2xi32, #tpu.memory_space<smem>>) -> (i32, i32) {
    %c0_i32 = arith.constant 0 : i32
    %c0_i32_0 = arith.constant 0 : i32
    %c0_i32_1 = arith.constant 0 : i32
    return %c0_i32, %c0_i32_0 : i32, i32
  }
  func.func @transform_11(%arg0: i32, %arg1: memref<2xi32, #tpu.memory_space<smem>>) -> (i32, i32, i32) {
    %c0_i32 = arith.constant 0 : i32
    %c0_i32_0 = arith.constant 0 : i32
    %c0_i32_1 = arith.constant 0 : i32
    return %arg0, %c0_i32, %c0_i32_0 : i32, i32, i32
  }
  func.func @transform_12(%arg0: i32, %arg1: memref<2xi32, #tpu.memory_space<smem>>) -> (i32, i32, i32) {
    %c0_i32 = arith.constant 0 : i32
    %c0_i32_0 = arith.constant 0 : i32
    %c0_i32_1 = arith.constant 0 : i32
    return %arg0, %c0_i32, %c0_i32_0 : i32, i32, i32
  }
}

</mosaic_0001>

<bundles_post_ra>
// kernel: tpu_custom_call.1
= control target key start
LH: loop header
LB: loop body
LE: loop exit
PB: predicated region body
PF: predicated region fallthrough
CT: control target
= control target key end

     0   :  { %s2543_s0 = inlined_call_operand.vmem [shape: s32[2], index: 0, kind: input, shape index: {}]   ;;  %s2544_s1 = inlined_call_operand.vmem [shape: f32[2,8,32], index: 1, kind: input, shape index: {}]   ;;  %s2545_s2 = inlined_call_operand.vmem [shape: f32[2,8,1], index: 2, kind: input, shape index: {}]   ;;  %s2546_s3 = inlined_call_operand.vmem [shape: f32[2,8,512], index: 3, kind: input, shape index: {}]   ;;  %s2547_s4 = inlined_call_operand.hbm [shape: f32[8,8], index: 4, kind: input, shape index: {}]   ;;  %s2548_s5 = inlined_call_operand.hbm [shape: f32[1,32], index: 5, kind: input, shape index: {}]   ;;  %s2549_s6 = inlined_call_operand.hbm [shape: f32[1,32], index: 6, kind: input, shape index: {}]   ;;  %s2550_s7 = inlined_call_operand.vmem [shape: f32[32,16], index: 7, kind: input, shape index: {}]   ;;  %s2551_s8 = inlined_call_operand.hbm [shape: f32[1,16], index: 8, kind: input, shape index: {}]   ;;  %s2552_s9 = inlined_call_operand.vmem [shape: f32[16,16], index: 9, kind: input, shape index: {}]   ;;  %s2553_s10 = inlined_call_operand.hbm [shape: f32[16,16], index: 10, kind: input, shape index: {}]   ;;  %s2554_s11 = inlined_call_operand.vmem [shape: f32[16,1], index: 11, kind: input, shape index: {}]   ;;  %s2555_s12 = inlined_call_operand.vmem [shape: f32[2,3,32], index: 12, kind: output, shape index: {0}]   ;;  %s2556_s13 = inlined_call_operand.vmem [shape: f32[2,8,1], index: 13, kind: output, shape index: {1}]  }
   0x1   :  { %s19_s27 = sshll.u32 %s2543_s0, 4  ;;  %s20_s27 = int_to_ptr.vmem [resolvable:$true] %s19_s27 }
   0x2   :  { %s1937_s28 = scalar_lea.vmem %s20_s27, 16  ;;  %p1942_p1 = scmp.lt.s32.totalorder %s20_s27, %s20_s27 }
   0x3   :  { %p1938_p0 = scmp.ne.s32.totalorder %s20_s27, %s1937_s28  ;;  %p1943_p2 = scmp.lt.s32.totalorder %s1937_s28, %s1937_s28 }
   0x5   :  { %p1944_p3 = por %p1943_p2, %p1942_p1 }
   0x7   :  { %p1945_p4 = pnand %p1944_p3, %p1938_p0 }
   0x9   :  { %1948 = shalt.err (!%p1945_p4)  }
   0xa   :  { %s2111_s29 = smov [#allocation3]  }
   0xb   :  { %22 = dma.vmem_to_smem %s20_s27, 16, %s2111_s29, [#allocation2] }
   0xc   :  { %2093 = dma.done.wait [#allocation2], 16 }
   0xd   :  { %2094 = vsyncadd [#allocation2], 4294967280 }
   0xe   :  { %24 = sfence }
   0xf   :  { %25 = vsyncpa [#allocation5], 0 }
  0x10   :  { %26 = vsyncpa [#allocation7], 0 }
  0x11   :  { %27 = vsyncpa [#allocation10], 0  ;;  %s2197_s30 = smov 0  }
  0x12 LB: > { %s2112_s0 = smov [#allocation6]   ;;  %s2203_s15 = sadd.s32 4294967295, %s2109_s30   ;;  %s2109_s30 = sphi %s2197_s30, %s33_s30  }
  0x13   : > { %s360_s14 = sshll.u32 %s2112_s0, 4  ;;  %p1719_p5 = scmp.ge.s32.totalorder %s2109_s30, 1  ;;  %s2208_s14 = int_to_ptr.vmem [resolvable:$true] %s360_s14 }
  0x14   : > { %p336_p6 = scmp.lt.s32.totalorder %s2109_s30, 3  ;;  %p2557_p7 = scmp.eq.s32.totalorder %s2203_s15, 0 }
  0x15   : > { %s2113_s17 = smov [#allocation9]   ;;  %s2114_s19 = smov [#allocation4]  }
  0x16   : > { %p2210_p8 = pnand %p1719_p5, %p336_p6  ;;  %s385_s18 = sshll.u32 %s2113_s17, 4  ;;  %s2216_s18 = int_to_ptr.vmem [resolvable:$true] %s385_s18 }
  0x17   : > { %s349_s20 = sshll.u32 %s2114_s19, 4  ;;  %s2115_s22 = smov [#allocation8]   ;;  %s2224_s20 = int_to_ptr.vmem [resolvable:$true] %s349_s20 }
  0x18   : > { %s2559_s16 = scalar_select %p2210_p8, 1, 0 }
  0x19   : > { %p1874_p9 = pneg %p2210_p8  ;;  %s371_s23 = sshll.u32 %s2115_s22, 4  ;;  %s2226_s23 = int_to_ptr.vmem [resolvable:$true] %s371_s23 }
  0x1a   : > { %s1949_s26 = scalar_lea.hbm %s2548_s5, 16 }
  0x1b   : > { %p2220_p10 = pnand %p2557_p7, %p1874_p9  ;;  %p1950_p11 = scmp.ne.s32.totalorder %s2548_s5, %s1949_s26 }
  0x1c   : > { %p1956_p1 = scmp.lt.u32.totalorder %s1949_s26, %s2548_s5 }
  0x1d   : > { %p2236_p12 = pneg %p2220_p10 }
  0x1f   : > { %p1952_p13 = pnand %p2236_p12, %p1950_p11 }
  0x21   : > { %p1953_p0 = pneg %p1952_p13 }
  0x23   : > { %p1958_p2 = pnand %p1956_p1, %p1953_p0 }
  0x25   : > { %1961 = shalt.err (!%p1958_p2)
}
  0x26   : > { %s1962_s19 = scalar_lea.vmem %s2208_s14, 16  ;;  %s1969_s22 = scalar_lea.vmem %s2208_s14, 32 }
  0x27   : > { %p1963_p3 = scmp.ne.s32.totalorder %s2208_s14, %s1962_s19  ;;  %p1970_p6 = scmp.lt.s32.totalorder %s2208_s14, %s2208_s14 }
  0x28   : > { %p1971_p9 = scmp.lt.s32.totalorder %s1969_s22, %s1962_s19 }
  0x29   : > { %p1965_p4 = pnand %p1963_p3, %p2236_p12 }
  0x2a   : > { %p1972_p11 = por %p1971_p9, %p1970_p6 }
  0x2b   : > { %p1966_p5 = pneg %p1965_p4 }
  0x2d   : > { %p1973_p13 = pnand %p1972_p11, %p1966_p5 }
  0x2f   : > { %1976 = shalt.err (!%p1973_p13)
}
  0x30   : > { %1880 = dma.hbm_to_vmem [thread:$0]  (!%p2220_p10), %s2548_s5, 16, %s2208_s14, [#allocation7]  }
  0x31   : > { %s1977_s28 = scalar_lea.hbm %s2551_s8, 16 }
  0x32   : > { %p1978_p0 = scmp.ne.s32.totalorder %s2551_s8, %s1977_s28  ;;  %p1984_p3 = scmp.lt.u32.totalorder %s1977_s28, %s2551_s8 }
  0x34   : > { %p1980_p1 = pnand %p1978_p0, %p2236_p12 }
  0x36   : > { %p1981_p2 = pneg %p1980_p1 }
  0x38   : > { %p1986_p4 = pnand %p1984_p3, %p1981_p2 }
  0x3a   : > { %1989 = shalt.err (!%p1986_p4)
}
  0x3b   : > { %s1990_s14 = scalar_lea.vmem %s2216_s18, 16  ;;  %s1997_s24 = scalar_lea.vmem %s2216_s18, 32 }
  0x3c   : > { %p1991_p5 = scmp.ne.s32.totalorder %s2216_s18, %s1990_s14  ;;  %p1998_p11 = scmp.lt.s32.totalorder %s2216_s18, %s2216_s18 }
  0x3d   : > { %p1999_p13 = scmp.lt.s32.totalorder %s1997_s24, %s1990_s14 }
  0x3e   : > { %p1993_p6 = pnand %p1991_p5, %p2236_p12 }
  0x3f   : > { %p2000_p0 = por %p1999_p13, %p1998_p11 }
  0x40   : > { %p1994_p9 = pneg %p1993_p6 }
  0x42   : > { %p2001_p1 = pnand %p2000_p0, %p1994_p9 }
  0x44   : > { %2004 = shalt.err (!%p2001_p1)
}
  0x45   : > { %1886 = dma.hbm_to_vmem [thread:$0]  (!%p2220_p10), %s2551_s8, 16, %s2216_s18, [#allocation10]  }
  0x46   : > { %s2005_s0 = scalar_lea.hbm %s2547_s4, 128 }
  0x47   : > { %p2006_p2 = scmp.ne.s32.totalorder %s2547_s4, %s2005_s0  ;;  %p2012_p5 = scmp.lt.u32.totalorder %s2005_s0, %s2547_s4 }
  0x49   : > { %p2008_p3 = pnand %p2006_p2, %p2236_p12 }
  0x4b   : > { %p2009_p4 = pneg %p2008_p3 }
  0x4d   : > { %p2014_p6 = pnand %p2012_p5, %p2009_p4 }
  0x4f   : > { %2017 = shalt.err (!%p2014_p6)
}
  0x50   : > { %s2018_s18 = scalar_lea.vmem %s2224_s20, 128  ;;  %p2026_p0 = scmp.lt.s32.totalorder %s2224_s20, %s2224_s20 }
  0x51   : > { %p2019_p9 = scmp.ne.s32.totalorder %s2224_s20, %s2018_s18  ;;  %p2027_p1 = scmp.lt.s32.totalorder %s2018_s18, %s2018_s18 }
  0x53   : > { %p2021_p11 = pnand %p2019_p9, %p2236_p12  ;;  %p2028_p2 = por %p2027_p1, %p2026_p0 }
  0x55   : > { %p2022_p13 = pneg %p2021_p11 }
  0x57   : > { %p2029_p3 = pnand %p2028_p2, %p2022_p13 }
  0x59   : > { %2032 = shalt.err (!%p2029_p3)
}
  0x5a   : > { %1877 = dma.hbm_to_vmem [thread:$0]  (!%p2220_p10), %s2547_s4, 128, %s2224_s20, [#allocation5]  }
  0x5b   : > { %s2033_s28 = scalar_lea.hbm %s2549_s6, 16 }
  0x5c   : > { %p2034_p4 = scmp.ne.s32.totalorder %s2549_s6, %s2033_s28  ;;  %p2040_p9 = scmp.lt.u32.totalorder %s2033_s28, %s2549_s6 }
  0x5e   : > { %p2036_p5 = pnand %p2034_p4, %p2236_p12 }
  0x60   : > { %p2037_p6 = pneg %p2036_p5 }
  0x62   : > { %p2042_p11 = pnand %p2040_p9, %p2037_p6 }
  0x64   : > { %2045 = shalt.err (!%p2042_p11)
}
  0x65   : > { %s2046_s20 = scalar_lea.vmem %s2226_s23, 16  ;;  %s2053_s14 = scalar_lea.vmem %s2226_s23, 32 }
  0x66   : > { %p2047_p13 = scmp.ne.s32.totalorder %s2226_s23, %s2046_s20  ;;  %p2054_p2 = scmp.lt.s32.totalorder %s2226_s23, %s2226_s23 }
  0x67   : > { %p2055_p3 = scmp.lt.s32.totalorder %s2053_s14, %s2046_s20 }
  0x68   : > { %p2049_p0 = pnand %p2047_p13, %p2236_p12 }
  0x69   : > { %p2056_p4 = por %p2055_p3, %p2054_p2 }
  0x6a   : > { %p2050_p1 = pneg %p2049_p0 }
  0x6c   : > { %p2057_p5 = pnand %p2056_p4, %p2050_p1 }
  0x6e   : > { %2060 = shalt.err (!%p2057_p5)
}
  0x6f   : > { %1883 = dma.hbm_to_vmem [thread:$0]  (!%p2220_p10), %s2549_s6, 16, %s2226_s23, [#allocation7]  }
  0x70   : > { %s2116_s25 = smov [#allocation11]   ;;  %s2061_s0 = scalar_lea.hbm %s2553_s10, 256 }
  0x71   : > { %s398_s26 = sshll.u32 %s2116_s25, 4  ;;  %p2062_p6 = scmp.ne.s32.totalorder %s2553_s10, %s2061_s0  ;;  %s399_s26 = int_to_ptr.vmem [resolvable:$true] %s398_s26 }
  0x72   : > { %p2068_p13 = scmp.lt.u32.totalorder %s2061_s0, %s2553_s10 }
  0x73   : > { %p2064_p9 = pnand %p2062_p6, %p2236_p12 }
  0x75   : > { %p2065_p11 = pneg %p2064_p9 }
  0x77   : > { %p2070_p0 = pnand %p2068_p13, %p2065_p11 }
  0x79   : > { %2073 = shalt.err (!%p2070_p0)
}
  0x7a   : > { %s2074_s23 = scalar_lea.vmem %s399_s26, 256  ;;  %p2082_p4 = scmp.lt.s32.totalorder %s399_s26, %s399_s26 }
  0x7b   : > { %p2075_p1 = scmp.ne.s32.totalorder %s399_s26, %s2074_s23  ;;  %p2083_p5 = scmp.lt.s32.totalorder %s2074_s23, %s2074_s23 }
  0x7d   : > { %p2077_p2 = pnand %p2075_p1, %p2236_p12  ;;  %p2084_p7 = por %p2083_p5, %p2082_p4 }
  0x7f   : > { %p2078_p3 = pneg %p2077_p2 }
  0x81   : > { %p2085_p8 = pnand %p2084_p7, %p2078_p3 }
  0x83   : > { %2088 = shalt.err (!%p2085_p8)
}
  0x84   : > { %s2117_s14 = smov 128   ;;  %s2118_s18 = smov 8  }
  0x85   : > { %1889 = dma.hbm_to_vmem [thread:$0]  (!%p2220_p10), %s2553_s10, 256, %s399_s26, [#allocation10], %s2117_s14, %s2117_s14, %s2118_s18  }
  0x86   : > { %p2562_p6 = scmp.ne.s32.totalorder %s2559_s16, 0 }
  0x87   : > { %p2563_p9 = scmp.eq.s32.totalorder (!%p2562_p6), %s2203_s15, 0 }
  0x88   : > { %439 = sbr.rel (%p2562_p6) target bundleno = 2359 (0x937), region = 64 }
  0x8f   : > { %2096 = dma.done.wait (%p2563_p9), [#allocation5], 128   ;;  %p2564_p12 = pmov %p2563_p9 }
  0x90   : > { %p2565_p7 = pmov %p2563_p9 }
  0x91   : > { %2098 = vsyncadd (%p2564_p12), [#allocation5], 4294967168 }
  0x92   : > { %2100 = dma.done.wait (%p2565_p7), [#allocation7], 32   ;;  %p2566_p8 = pmov %p2565_p7 }
  0x93   : > { %p2567_p11 = pmov %p2565_p7 }
  0x94   : > { %2102 = vsyncadd (%p2566_p8), [#allocation7], 4294967264 }
  0x95   : > { %2104 = dma.done.wait (%p2567_p11), [#allocation10], 272   ;;  %p2568_p10 = pmov %p2565_p7 }
  0x96   : > { %p508_p13 = scmp.lt.s32.totalorder %s2203_s15, 1  ;;  %vm531_vm0 = vcmask 261120   ;;  %v562_v7 = vld [vmem:[%s2550_s7] sm:$0xff]  ;;  %v563_v8 = vld [vmem:[%s2550_s7 + $0x8] sm:$0xff]  ;;  %v564_v9 = vld [vmem:[%s2550_s7 + $0x10] sm:$0xff]  ;;  %v2119_v10 = vmov 0.0|0.0   ;;  %v673_v15 = vlaneseq }
  0x97   : > { %2106 = vsyncadd (%p2568_p10), [#allocation10], 4294967024  ;;  %1839 = vmatprep.subr.bf16.mxu0 %v2119_v10  ;;  %v1840_v11 = vpack.c.bf16 %v563_v8, %v562_v7  ;;  %v565_v12 = vld [vmem:[%s2550_s7 + $0x18] sm:$0xff]  ;;  %vm2120_vm1 = vmmov 0   ;;  %v2121_v13 = vmov 0.0   ;;  %s529_s18 = sld [smem:[#allocation3 + %s2203_s15]] }
  0x98   : > { %s2363_s16 = scalar_select %p508_p13, %s2203_s15, 1  ;;  %1805 = vmatprep.mubr.msk.f32.mxu0 %vm2120_vm1, %v2121_v13  ;;  %1808 = vmatprep.subr.mxu1 %v2121_v13  ;;  %v1843_v14 = vpack.c.bf16 %v565_v12, %v564_v9  ;;  %v2400_v16 = vshrl.u32 %v673_v15, 7  ;;  %v1738_v23 = vld [vmem:[#allocation6] ss:$0 sm:$0xff]  ;;  %v1739_v25 = vld [vmem:[#allocation8] ss:$0 sm:$0xff] }
  0x99   : > { %1810 = vmatprep.mubr.msk.f32.mxu1 %vm2120_vm1, %v2121_v13  ;;  %1841 = vmatpush3.bf16.msra.mxu0 %v1840_v11  ;;  %v1740_v28 = vld [vmem:[#allocation9] ss:$0 sm:$0xff]  ;;  %v2122_v52 = vmov -1.0   ;;  %v787_v55 = vld [vmem:[#allocation11] sm:$0xff]  ;;  %v788_v56 = vld [vmem:[#allocation11 + $0x8] sm:$0xff]  ;;  %vm711_vm4 = vcmask 64512  }
  0x9a   : > { %s2366_s21 = sshll.u32 %s2363_s16, 3  ;;  %1842 = vmatprep.subr.bf16.mxu0 %v2119_v10  ;;  %v1846_v61 = vpack.c.bf16 %v788_v56, %v787_v55  ;;  %v785_v62 = vld [vmem:[%s2552_s9] sm:$0xff]  ;;  %v786_v63 = vld [vmem:[%s2552_s9 + $0x8] sm:$0xff]  ;;  %vm789_vm5 = vcmask 130048   ;;  %v865_v7 = vsub.s32 0, %v2400_v16  ;;  %vm1050_vm7 = vcmask 7168  }
  0x9b   : > { %s511_s27 = scalar_lea.vmem %s2544_s1, %s2366_s21  ;;  %s515_s22 = scalar_lea.vmem %s2545_s2, %s2366_s21 }
  0x9c   : > { %v2372_v0 = vld [vmem:[%s511_s27] sm:$0xff]  ;;  %s528_s14 = scalar_lea.vmem %s2556_s13, %s2366_s21  ;;  %s1736_s21 = sshll.u32 %s2363_s16, 2 }
  0x9d   : > { %v532_v1 = vsel %vm531_vm0, %v2372_v0, 0.0  ;;  %1844 = vmatpush3.bf16.msra.mxu0 %v1843_v14  ;;  %v675_v17 = vstv %s529_s18  ;;  %s1778_s18 = sshll.u32 %s2363_s16, 5  ;;  %s524_s27 = scalar_lea.vmem %s2555_s12, %s1736_s21 }
  0x9e   : > { %533 = vadd.xlane.f32.xlu0 %v532_v1  ;;  %1851 = vmatprep.subr.bf16.mxu0 %v2119_v10  ;;  %vm676_vm2 = vcmp.eq.s32.totalorder %v2400_v16, %v675_v17  ;;  %v1849_v1 = vpack.c.bf16 %v786_v63, %v785_v62  ;;  %s520_s25 = scalar_lea.vmem %s2546_s3, %s1778_s18 }
  0x9f   : > { %v2404_v18 = vsel %vm676_vm2, 1.0, %v2121_v13  ;;  %v1055_v55 = vld [vmem:[%s520_s25 + $0x18] sm:$0xff] }
  0xa0   : > { %679 = vxpose.xlu1.b32.start.end [1/1] (short) (narrow) %v2404_v18, 8 }
 0x120   : > { %v695_v60 = vpop.trf.xlu1 }
 0x12b   : > { %v534_v2 = vpop.xlane.xlu0 %533 }
 0x12c   : > { %v536_v3 = vmul.f32 0.03125, %v534_v2 }
 0x12e   : > { %v537_v4 = vsub.f32 %v2372_v0, %v536_v3 }
 0x130   : > { %v538_v5 = vmul.f32 %v537_v4, %v537_v4 }
 0x132   : > { %v539_v6 = vsel %vm531_vm0, %v538_v5, 0.0  ;;  %v968_v5 = vld [vmem:[%s2554_s11 + $0x8] sm:$0xff] }
 0x133   : > { %540 = vadd.xlane.f32.xlu0 %v539_v6 }
 0x1c0   : > { %v541_v19 = vpop.xlane.xlu0 %540 }
 0x1c1   : > { %v542_v20 = vmul.f32 0.03125, %v541_v19 }
 0x1c3   : > { %v543_v21 = vadd.f32 1e-05, %v542_v20 }
 0x1c5   : > { %1923 = vrsqrt.f32 %v543_v21 }
 0x1cf   : > { %v1924_v22 = vpop.eup %1923 }
 0x1d0   : > { %v545_v24 = vmul.f32 %v1924_v22, %v537_v4  ;;  %v967_v4 = vld [vmem:[%s2554_s11] sm:$0xff] }
 0x1d1   : > { %v1852_v6 = vpack.c.bf16 %v968_v5, %v967_v4 }
 0x1d2   : > { %v553_v26 = vmul.f32 %v1738_v23, %v545_v24 }
 0x1d4   : > { %v561_v27 = vadd.f32 %v1739_v25, %v553_v26 }
 0x1d6   : > { %1806 = vmatmul.mubr.msk.f32.vlgmr.msra.gmra.mrb[0].mxu0 %vm531_vm0, %v561_v27 }
 0x1d7   : > { %1831 = vmatprep.mubr.msk.f32.mxu0 %vm2120_vm1, %v2121_v13  ;;  %1853 = vmatpush3.bf16.msra.mxu0 %v1852_v6 }
 0x2a9   : > { %v642_v29 = vpop.f32.mrb[0].mxu0 }
 0x2aa   : > { %v643_v30 = vadd.f32 %v1740_v28, %v642_v29  ;;  %v1807_v31 = vpop.f32.mrb[1].mxu0 }
 0x2ac   : > { %v647_v32 = vmul.f32 0.70710677, %v643_v30  ;;  %v646_v57 = vmul.f32 0.5, %v643_v30 }
 0x2ae   : > { %v650_v33 = vand.u32 2147483647, %v647_v32  ;;  %vm648_vm3 = vcmp.ge.f32.partialorder %v647_v32, 0.0 }
 0x2af   : > { %v649_v53 = vsel %vm648_vm3, 1.0, %v2122_v52 }
 0x2b0   : > { %v651_v34 = vmul.f32 0.3275911, %v650_v33  ;;  %v664_v36 = vsub.f32 0.0, %v650_v33 }
 0x2b2   : > { %v652_v35 = vadd.f32 1.0, %v651_v34  ;;  %v665_v38 = vmul.f32 %v664_v36, %v650_v33 }
 0x2b4   : > { %1925 = vrcp.f32 %v652_v35  ;;  %v666_v41 = vmul.f32 1.442695, %v665_v38 }
 0x2b6   : > { %1927 = vpow2.f32 %v666_v41 }
 0x2be   : > { %v1926_v37 = vpop.eup %1925 }
 0x2bf   : > { %v655_v39 = vmul.f32 1.0614054, %v1926_v37 }
 0x2c0   : > { %v1928_v49 = vpop.eup %1927 }
 0x2c1   : > { %v656_v40 = vadd.f32 -1.4531521, %v655_v39 }
 0x2c3   : > { %v657_v42 = vmul.f32 %v1926_v37, %v656_v40 }
 0x2c5   : > { %v658_v43 = vadd.f32 1.4214138, %v657_v42 }
 0x2c7   : > { %v659_v44 = vmul.f32 %v1926_v37, %v658_v43  ;;  %v2123_v43 = vmov 0  }
 0x2c8   : > { %1921 = vset.pattern.permute.xlu1 %v2123_v43 }
 0x2c9   : > { %v660_v45 = vadd.f32 -0.28449672, %v659_v44 }
 0x2cb   : > { %v661_v46 = vmul.f32 %v1926_v37, %v660_v45 }
 0x2cd   : > { %v662_v47 = vadd.f32 0.2548296, %v661_v46 }
 0x2cf   : > { %v663_v48 = vmul.f32 %v1926_v37, %v662_v47 }
 0x2d1   : > { %v668_v50 = vmul.f32 %v1928_v49, %v663_v48  ;;  %v1048_v49 = vld [vmem:[%s515_s22] sm:$0xff] }
 0x2d3   : > { %v669_v51 = vsub.f32 1.0, %v668_v50 }
 0x2d5   : > { %v670_v54 = vmul.f32 %v669_v51, %v649_v53  ;;  %v1053_v53 = vld [vmem:[%s520_s25 + $0x8] sm:$0xff] }
 0x2d7   : > { %v671_v58 = vadd.f32 1.0, %v670_v54  ;;  %v1054_v54 = vld [vmem:[%s520_s25 + $0x10] sm:$0xff] }
 0x2d9   : > { %v672_v59 = vmul.f32 %v671_v58, %v646_v57  ;;  %v1057_v57 = vmul.f32 0.05, %v1053_v53  ;;  %v1058_v58 = vmul.f32 0.05, %v1054_v54 }
 0x2db   : > { %1809 = vmatpush3.msra.mxu1 %v672_v59 }
 0x2dc   : > { %1811 = vmatmul.mubr.msk.f32.vlgmr.msra.gmra.mrb[0].mxu1 %vm711_vm4, %v695_v60  ;;  %1845 = vmatprep.subr.bf16.mxu1 %v2119_v10 }
 0x2dd   : > { %1847 = vmatpush3.bf16.msra.mxu1 %v1846_v61  ;;  %1817 = vmatprep.mubr.msk.f32.mxu1 %vm2120_vm1, %v2121_v13 }
 0x2de   : > { %1848 = vmatprep.subr.bf16.mxu1 %v2119_v10 }
 0x3af   : > { %v781_v2 = vpop.f32.mrb[0].mxu1 }
 0x3b0   : > { %v1812_v3 = vpop.f32.mrb[1].mxu1  ;;  %1818 = vmatmul.mubr.msk.f32.vlgmr.msra.gmra.mrb[2].mxu1 %vm789_vm5, %v781_v2 }
 0x3b1   : > { %1850 = vmatpush3.bf16.msra.mxu1 %v1849_v1  ;;  %1824 = vmatprep.mubr.msk.f32.mxu1 %vm2120_vm1, %v2121_v13 }
 0x3b4   : > { %1825 = vmatmul.mubr.msk.f32.vlgmr.msra.gmra.mrb[4].mxu1 %vm789_vm5, %v672_v59  ;;  %v1059_v59 = vmul.f32 0.05, %v1055_v55 }
 0x3b5   : > { %1307 = vmatprep.mubr.f32.mxu1 %v2121_v13 }
 0x483   : > { %v859_v8 = vpop.f32.mrb[2].mxu1 }
 0x484   : > { %v1819_v9 = vpop.f32.mrb[3].mxu1  ;;  %v866_v10 = vrot.slane %v859_v8, %v865_v7 }
 0x487   : > { %v936_v11 = vpop.f32.mrb[4].mxu1 }
 0x488   : > { %v937_v12 = vadd.f32 %v936_v11, %v866_v10  ;;  %v1826_v14 = vpop.f32.mrb[5].mxu1 }
 0x48a   : > { %v941_v17 = vmul.f32 0.70710677, %v937_v12  ;;  %v940_v40 = vmul.f32 0.5, %v937_v12 }
 0x48c   : > { %v944_v19 = vand.u32 2147483647, %v941_v17  ;;  %vm942_vm6 = vcmp.ge.f32.partialorder %v941_v17, 0.0 }
 0x48d   : > { %v943_v38 = vsel %vm942_vm6, 1.0, %v2122_v52  ;;  %v1052_v52 = vld [vmem:[%s520_s25] sm:$0xff] }
 0x48e   : > { %v945_v20 = vmul.f32 0.3275911, %v944_v19  ;;  %v958_v22 = vsub.f32 0.0, %v944_v19  ;;  %v1056_v56 = vmul.f32 0.05, %v1052_v52 }
 0x490   : > { %v946_v21 = vadd.f32 1.0, %v945_v20  ;;  %v959_v24 = vmul.f32 %v958_v22, %v944_v19 }
 0x492   : > { %1929 = vrcp.f32 %v946_v21  ;;  %v960_v27 = vmul.f32 1.442695, %v959_v24 }
 0x494   : > { %1931 = vpow2.f32 %v960_v27 }
 0x49c   : > { %v1930_v23 = vpop.eup %1929 }
 0x49d   : > { %v949_v25 = vmul.f32 1.0614054, %v1930_v23 }
 0x49e   : > { %v1932_v35 = vpop.eup %1931 }
 0x49f   : > { %v950_v26 = vadd.f32 -1.4531521, %v949_v25 }
 0x4a1   : > { %v951_v28 = vmul.f32 %v1930_v23, %v950_v26  ;;  %v2466_v26 = vcvt.s32.f32 %v2400_v16 }
 0x4a3   : > { %v952_v29 = vadd.f32 1.4214138, %v951_v28 }
 0x4a5   : > { %v953_v30 = vmul.f32 %v1930_v23, %v952_v29 }
 0x4a7   : > { %v954_v31 = vadd.f32 -0.28449672, %v953_v30 }
 0x4a9   : > { %v955_v32 = vmul.f32 %v1930_v23, %v954_v31 }
 0x4ab   : > { %v956_v33 = vadd.f32 0.2548296, %v955_v32 }
 0x4ad   : > { %v957_v34 = vmul.f32 %v1930_v23, %v956_v33 }
 0x4af   : > { %v962_v36 = vmul.f32 %v1932_v35, %v957_v34 }
 0x4b1   : > { %v963_v37 = vsub.f32 1.0, %v962_v36 }
 0x4b3   : > { %v964_v39 = vmul.f32 %v963_v37, %v943_v38 }
 0x4b5   : > { %v965_v41 = vadd.f32 1.0, %v964_v39 }
 0x4b7   : > { %v966_v42 = vmul.f32 %v965_v41, %v940_v40 }
 0x4b9   : > { %1832 = vmatmul.mubr.msk.f32.vlgmr.msra.gmra.mrb[2].mxu0 %vm789_vm5, %v966_v42 }
 0x4ba   : > { %1378 = vmatprep.mubr.f32.mxu0 %v2121_v13 }
 0x58c   : > { %v1038_v44 = vpop.f32.mrb[2].mxu0 }
 0x58d   : > { %v1747_v45 = vmul.f32 -1.442695, %v1038_v44  ;;  %v1833_v46 = vpop.f32.mrb[3].mxu0 }
 0x58f   : > { %1933 = vpow2.f32 %v1747_v45 }
 0x599   : > { %v1934_v47 = vpop.eup %1933 }
 0x59a   : > { %v1045_v48 = vadd.f32 1.0, %v1934_v47 }
 0x59c   : > { %1935 = vrcp.f32 %v1045_v48 }
 0x5a6   : > { %v1936_v50 = vpop.eup %1935 }
 0x5a7   : > { %v1049_v51 = vmul.f32 %v1936_v50, %v1048_v49 }
 0x5a9   : > { %1062 = vperm.xlu1 %1921, %v1049_v51   ;;  %1051 = vst.msk [vmem:[%s528_s14] sm:$0xff] %vm1050_vm7, %v1049_v51 }
 0x628   : > { %v1063_v60 = vpop.permute.xlu1 %1062 }
 0x629   : > { %v2449_v61 = vadd.f32 %v1063_v60, %v1056_v56  ;;  %v2451_v62 = vadd.f32 %v1063_v60, %v1057_v57  ;;  %v2453_v63 = vadd.f32 %v1063_v60, %v1058_v58  ;;  %v2455_v1 = vadd.f32 %v1063_v60, %v1059_v59 }
 0x62b   : > { %v1087_v2 = vrot.slane %v2449_v61, 4  ;;  %v1093_v3 = vrot.slane %v2451_v62, 4  ;;  %v1099_v4 = vrot.slane %v2453_v63, 4  ;;  %v1105_v5 = vrot.slane %v2455_v1, 4 }
 0x62d   : > { %v1088_v6 = vmax.f32 %v2449_v61, %v1087_v2  ;;  %v1094_v7 = vmax.f32 %v2451_v62, %v1093_v3  ;;  %v1100_v8 = vmax.f32 %v2453_v63, %v1099_v4  ;;  %v1106_v9 = vmax.f32 %v2455_v1, %v1105_v5 }
 0x62f   : > { %v1089_v10 = vrot.slane %v1088_v6, 2  ;;  %v1095_v11 = vrot.slane %v1094_v7, 2  ;;  %v1101_v12 = vrot.slane %v1100_v8, 2  ;;  %v1107_v14 = vrot.slane %v1106_v9, 2 }
 0x631   : > { %v1090_v17 = vmax.f32 %v1088_v6, %v1089_v10  ;;  %v1096_v19 = vmax.f32 %v1094_v7, %v1095_v11  ;;  %v1102_v20 = vmax.f32 %v1100_v8, %v1101_v12  ;;  %v1108_v21 = vmax.f32 %v1106_v9, %v1107_v14 }
 0x633   : > { %v1091_v22 = vrot.slane %v1090_v17, 1  ;;  %v1097_v23 = vrot.slane %v1096_v19, 1  ;;  %v1103_v24 = vrot.slane %v1102_v20, 1  ;;  %v1109_v25 = vrot.slane %v1108_v21, 1 }
 0x635   : > { %v1092_v27 = vmax.f32 %v1090_v17, %v1091_v22  ;;  %v1098_v28 = vmax.f32 %v1096_v19, %v1097_v23  ;;  %v1104_v29 = vmax.f32 %v1102_v20, %v1103_v24  ;;  %v1110_v30 = vmax.f32 %v1108_v21, %v1109_v25 }
 0x637   : > { %vm1111_vm8 = vcmp.eq.f32.partialorder %v2449_v61, %v1092_v27  ;;  %vm1112_vm9 = vcmp.eq.f32.partialorder %v2451_v62, %v1098_v28  ;;  %vm1113_vm10 = vcmp.eq.f32.partialorder %v2453_v63, %v1104_v29  ;;  %vm1114_vm11 = vcmp.eq.f32.partialorder %v2455_v1, %v1110_v30 }
 0x638   : > { %v1115_v31 = vsel %vm1111_vm8, %v2466_v26, 8.0  ;;  %v1116_v32 = vsel %vm1112_vm9, %v2466_v26, 8.0  ;;  %v1117_v33 = vsel %vm1113_vm10, %v2466_v26, 8.0  ;;  %v1118_v16 = vsel %vm1114_vm11, %v2466_v26, 8.0 }
 0x639   : > { %v1119_v34 = vrot.slane %v1115_v31, 4  ;;  %v1125_v35 = vrot.slane %v1116_v32, 4  ;;  %v1131_v36 = vrot.slane %v1117_v33, 4  ;;  %v1137_v37 = vrot.slane %v1118_v16, 4 }
 0x63b   : > { %v1120_v38 = vmin.f32 %v1115_v31, %v1119_v34  ;;  %v1132_v39 = vmin.f32 %v1117_v33, %v1131_v36  ;;  %v1126_v40 = vmin.f32 %v1116_v32, %v1125_v35  ;;  %v1138_v41 = vmin.f32 %v1118_v16, %v1137_v37 }
 0x63d   : > { %v1127_v42 = vrot.slane %v1126_v40, 2  ;;  %v1139_v44 = vrot.slane %v1138_v41, 2  ;;  %v1121_v45 = vrot.slane %v1120_v38, 2  ;;  %v1133_v46 = vrot.slane %v1132_v39, 2 }
 0x63f   : > { %v1128_v47 = vmin.f32 %v1126_v40, %v1127_v42  ;;  %v1140_v48 = vmin.f32 %v1138_v41, %v1139_v44  ;;  %v1122_v49 = vmin.f32 %v1120_v38, %v1121_v45  ;;  %v1134_v50 = vmin.f32 %v1132_v39, %v1133_v46 }
 0x641   : > { %v1129_v51 = vrot.slane %v1128_v47, 1  ;;  %v1141_v52 = vrot.slane %v1140_v48, 1  ;;  %v1123_v53 = vrot.slane %v1122_v49, 1  ;;  %v1135_v54 = vrot.slane %v1134_v50, 1 }
 0x643   : > { %v1130_v55 = vmin.f32 %v1128_v47, %v1129_v51  ;;  %v1142_v56 = vmin.f32 %v1140_v48, %v1141_v52  ;;  %v1124_v57 = vmin.f32 %v1122_v49, %v1123_v53  ;;  %v1136_v58 = vmin.f32 %v1134_v50, %v1135_v54 }
 0x645   : > { %vm1144_vm12 = vcmp.eq.f32.partialorder %v2466_v26, %v1130_v55  ;;  %vm1146_vm13 = vcmp.eq.f32.partialorder %v2466_v26, %v1142_v56  ;;  %vm1143_vm14 = vcmp.eq.f32.partialorder %v2466_v26, %v1124_v57  ;;  %vm1145_vm15 = vcmp.eq.f32.partialorder %v2466_v26, %v1136_v58 }
 0x646   : > { %v2481_v59 = vsel %vm1144_vm12, 1.0, %v2121_v13  ;;  %v2484_v60 = vsel %vm1146_vm13, 1.0, %v2121_v13  ;;  %v2487_v2 = vsel %vm1143_vm14, 1.0, %v2121_v13  ;;  %v2490_v3 = vsel %vm1145_vm15, 1.0, %v2121_v13 }
 0x647   : > { %vm1160_vm0 = vcmp.gt.f32.partialorder %v2481_v59, 0.0  ;;  %vm1162_vm2 = vcmp.gt.f32.partialorder %v2484_v60, 0.0  ;;  %vm1159_vm3 = vcmp.gt.f32.partialorder %v2487_v2, 0.0  ;;  %vm1161_vm5 = vcmp.gt.f32.partialorder %v2490_v3, 0.0 }
 0x648   : > { %v1164_v4 = vsel %vm1160_vm0, -inf, %v2451_v62  ;;  %v1166_v5 = vsel %vm1162_vm2, -inf, %v2455_v1  ;;  %v1163_v6 = vsel %vm1159_vm3, -inf, %v2449_v61  ;;  %v1165_v7 = vsel %vm1161_vm5, -inf, %v2453_v63 }
 0x649   : > { %v1173_v8 = vrot.slane %v1164_v4, 4  ;;  %v1185_v9 = vrot.slane %v1166_v5, 4  ;;  %v1167_v10 = vrot.slane %v1163_v6, 4  ;;  %v1179_v11 = vrot.slane %v1165_v7, 4 }
 0x64b   : > { %v1174_v12 = vmax.f32 %v1164_v4, %v1173_v8  ;;  %v1186_v14 = vmax.f32 %v1166_v5, %v1185_v9  ;;  %v1168_v17 = vmax.f32 %v1163_v6, %v1167_v10  ;;  %v1180_v19 = vmax.f32 %v1165_v7, %v1179_v11 }
 0x64d   : > { %v1175_v20 = vrot.slane %v1174_v12, 2  ;;  %v1187_v21 = vrot.slane %v1186_v14, 2  ;;  %v1169_v22 = vrot.slane %v1168_v17, 2  ;;  %v1181_v23 = vrot.slane %v1180_v19, 2 }
 0x64f   : > { %v1176_v24 = vmax.f32 %v1174_v12, %v1175_v20  ;;  %v1188_v62 = vmax.f32 %v1186_v14, %v1187_v21  ;;  %v1170_v25 = vmax.f32 %v1168_v17, %v1169_v22  ;;  %v1182_v1 = vmax.f32 %v1180_v19, %v1181_v23  ;;  %v1239_v17 = vld [vmem:[#allocation4] sm:$0xff] }
 0x651   : > { %v1177_v27 = vrot.slane %v1176_v24, 1  ;;  %v1189_v61 = vrot.slane %v1188_v62, 1  ;;  %v1171_v28 = vrot.slane %v1170_v25, 1  ;;  %v1183_v63 = vrot.slane %v1182_v1, 1 }
 0x653   : > { %v1178_v29 = vmax.f32 %v1176_v24, %v1177_v27  ;;  %v1190_v30 = vmax.f32 %v1188_v62, %v1189_v61  ;;  %v1172_v31 = vmax.f32 %v1170_v25, %v1171_v28  ;;  %v1184_v32 = vmax.f32 %v1182_v1, %v1183_v63 }
 0x655   : > { %vm1192_vm6 = vcmp.eq.f32.partialorder %v1164_v4, %v1178_v29  ;;  %vm1194_vm8 = vcmp.eq.f32.partialorder %v1166_v5, %v1190_v30  ;;  %vm1191_vm9 = vcmp.eq.f32.partialorder %v1163_v6, %v1172_v31  ;;  %vm1193_vm10 = vcmp.eq.f32.partialorder %v1165_v7, %v1184_v32 }
 0x656   : > { %v1196_v33 = vsel %vm1192_vm6, %v2466_v26, 8.0  ;;  %v1198_v16 = vsel %vm1194_vm8, %v2466_v26, 8.0  ;;  %v1195_v34 = vsel %vm1191_vm9, %v2466_v26, 8.0  ;;  %v1197_v35 = vsel %vm1193_vm10, %v2466_v26, 8.0 }
 0x657   : > { %v1205_v36 = vrot.slane %v1196_v33, 4  ;;  %v1217_v37 = vrot.slane %v1198_v16, 4  ;;  %v1199_v38 = vrot.slane %v1195_v34, 4  ;;  %v1211_v39 = vrot.slane %v1197_v35, 4 }
 0x658   : > { %vm1450_vm10 = vcmask 15360  }
 0x659   : > { %v1206_v40 = vmin.f32 %v1196_v33, %v1205_v36  ;;  %v1218_v41 = vmin.f32 %v1198_v16, %v1217_v37  ;;  %v1200_v42 = vmin.f32 %v1195_v34, %v1199_v38  ;;  %v1212_v44 = vmin.f32 %v1197_v35, %v1211_v39 }
 0x65b   : > { %v1207_v45 = vrot.slane %v1206_v40, 2  ;;  %v1219_v46 = vrot.slane %v1218_v41, 2  ;;  %v1201_v47 = vrot.slane %v1200_v42, 2  ;;  %v1213_v48 = vrot.slane %v1212_v44, 2 }
 0x65d   : > { %v1208_v49 = vmin.f32 %v1206_v40, %v1207_v45  ;;  %v1220_v50 = vmin.f32 %v1218_v41, %v1219_v46  ;;  %v1202_v51 = vmin.f32 %v1200_v42, %v1201_v47  ;;  %v1214_v52 = vmin.f32 %v1212_v44, %v1213_v48 }
 0x65f   : > { %v1209_v53 = vrot.slane %v1208_v49, 1  ;;  %v1221_v54 = vrot.slane %v1220_v50, 1  ;;  %v1203_v55 = vrot.slane %v1202_v51, 1  ;;  %v1215_v56 = vrot.slane %v1214_v52, 1 }
 0x661   : > { %v1210_v57 = vmin.f32 %v1208_v49, %v1209_v53  ;;  %v1222_v58 = vmin.f32 %v1220_v50, %v1221_v54  ;;  %v1204_v4 = vmin.f32 %v1202_v51, %v1203_v55  ;;  %v1216_v5 = vmin.f32 %v1214_v52, %v1215_v56 }
 0x663   : > { %vm1224_vm11 = vcmp.eq.f32.partialorder %v2466_v26, %v1210_v57  ;;  %vm1226_vm12 = vcmp.eq.f32.partialorder %v2466_v26, %v1222_v58  ;;  %vm1223_vm13 = vcmp.eq.f32.partialorder %v2466_v26, %v1204_v4  ;;  %vm1225_vm14 = vcmp.eq.f32.partialorder %v2466_v26, %v1216_v5 }
 0x664   : > { %v1754_v6 = vsel %vm1224_vm11, 1.0, %v2121_v13  ;;  %v1756_v7 = vsel %vm1226_vm12, 1.0, %v2121_v13  ;;  %v1753_v8 = vsel %vm1223_vm13, 1.0, %v2121_v13  ;;  %v1755_v9 = vsel %vm1225_vm14, 1.0, %v2121_v13 }
 0x665   : > { %v1236_v10 = vadd.f32 %v1754_v6, %v2481_v59  ;;  %v1238_v11 = vadd.f32 %v1756_v7, %v2484_v60  ;;  %v1235_v12 = vadd.f32 %v1753_v8, %v2487_v2  ;;  %v1237_v14 = vadd.f32 %v1755_v9, %v2490_v3 }
 0x666   : > { %v1071_v26 = vand.u32 127, %v673_v15  ;;  %vm1557_vm11 = vcmask 256000  }
 0x667   : > { %1243 = vmatprep.subr.mxu1 %v1236_v10  ;;  %1314 = vmatprep.subr.mxu0 %v1238_v11 }
 0x668   : > { %1244 = vmatpush1.msra.mxu1 %v1235_v12  ;;  %1315 = vmatpush1.msra.mxu0 %v1237_v14  ;;  %v1074_v59 = vadd.s32 384, %v1071_v26 }
 0x669   : > { %1757 = vmatmul.mubr.msk.f32.vlgmr.msra.gmra.mrb[6].mxu1 %vm711_vm4, %v1239_v17  ;;  %1758 = vmatmul.mubr.msk.f32.vlgmr.msra.gmra.mrb[4].mxu0 %vm711_vm4, %v1239_v17 }
 0x66a   : > { %1834 = vmatprep.subr.mxu1 %v2121_v13  ;;  %1836 = vmatprep.mubr.msk.f32.mxu1 %vm2120_vm1, %v2121_v13  ;;  %vm1078_vm15 = vcmp.lt.s32.totalorder %v1074_v59, 500 }
 0x66b   : > { %1835 = vmatpush3.msra.mxu1 %v2372_v0  ;;  %v1748_v24 = vsel %vm1078_vm15, 1.0, %v2121_v13 }
 0x73c   : > { %v1309_v60 = vpop.f32.mrb[6].mxu1  ;;  %v1380_v2 = vpop.f32.mrb[4].mxu0 }
 0x73d   : > { %v1385_v3 = vmul.f32 %v1309_v60, %v1235_v12  ;;  %v1387_v19 = vmul.f32 %v1380_v2, %v1237_v14  ;;  %v1311_v20 = vpop.f32.mrb[7].mxu1  ;;  %v1382_v21 = vpop.f32.mrb[5].mxu0 }
 0x73e   : > { %v1386_v22 = vmul.f32 %v1311_v20, %v1236_v10  ;;  %v1388_v23 = vmul.f32 %v1382_v21, %v1238_v11 }
 0x73f   : > { %v1759_v62 = vadd.f32 -1.0, %v1385_v3  ;;  %v1767_v25 = vadd.f32 -2.0, %v1385_v3  ;;  %v1761_v1 = vadd.f32 -1.0, %v1387_v19  ;;  %v1769_v27 = vadd.f32 -2.0, %v1387_v19 }
 0x740   : > { %v1760_v61 = vadd.f32 -1.0, %v1386_v22  ;;  %v1768_v0 = vadd.f32 -2.0, %v1386_v22  ;;  %v1762_v28 = vadd.f32 -1.0, %v1388_v23  ;;  %v1770_v15 = vadd.f32 -2.0, %v1388_v23 }
 0x741   : > { %v1393_v63 = vand.u32 2147483647, %v1759_v62  ;;  %v1423_v29 = vand.u32 2147483647, %v1767_v25  ;;  %v1395_v30 = vand.u32 2147483647, %v1761_v1 }
 0x742   : > { %v1425_v31 = vand.u32 2147483647, %v1769_v27  ;;  %v1394_v32 = vand.u32 2147483647, %v1760_v61  ;;  %v1424_v33 = vand.u32 2147483647, %v1768_v0 }
 0x743   : > { %vm1397_vm1 = vcmp.lt.f32.partialorder %v1393_v63, 0.5  ;;  %vm1427_vm0 = vcmp.lt.f32.partialorder %v1423_v29, 0.5  ;;  %vm1399_vm2 = vcmp.lt.f32.partialorder %v1395_v30, 0.5  ;;  %v1396_v16 = vand.u32 2147483647, %v1762_v28 }
 0x744   : > { %v1763_v34 = vsel %vm1397_vm1, 1.0, %v2121_v13  ;;  %v1771_v35 = vsel %vm1427_vm0, 1.0, %v2121_v13  ;;  %vm1429_vm3 = vcmp.lt.f32.partialorder %v1425_v31, 0.5  ;;  %vm1398_vm5 = vcmp.lt.f32.partialorder %v1394_v32, 0.5 }
 0x745   : > { %v1764_v36 = vsel %vm1398_vm5, 1.0, %v2121_v13  ;;  %vm1428_vm6 = vcmp.lt.f32.partialorder %v1424_v33, 0.5  ;;  %vm1400_vm8 = vcmp.lt.f32.partialorder %v1396_v16, 0.5  ;;  %v1426_v37 = vand.u32 2147483647, %v1770_v15 }
 0x746   : > { %v1772_v38 = vsel %vm1428_vm6, 1.0, %v2121_v13  ;;  %v1766_v39 = vsel %vm1400_vm8, 1.0, %v2121_v13  ;;  %v1413_v40 = vadd.f32 %v1764_v36, %v1763_v34  ;;  %v1765_v41 = vsel %vm1399_vm2, 1.0, %v2121_v13 }
 0x747   : > { %vm1430_vm9 = vcmp.lt.f32.partialorder %v1426_v37, 0.5  ;;  %v1443_v42 = vadd.f32 %v1772_v38, %v1771_v35  ;;  %v1412_v44 = vmul.f32 %v1766_v39, %v1748_v24  ;;  %v1773_v46 = vsel %vm1429_vm3, 1.0, %v2121_v13 }
 0x748   : > { %v1414_v45 = vadd.f32 %v1765_v41, %v1413_v40  ;;  %v1774_v47 = vsel %vm1430_vm9, 1.0, %v2121_v13 }
 0x749   : > { %v1442_v48 = vmul.f32 %v1774_v47, %v1748_v24  ;;  %v1444_v49 = vadd.f32 %v1773_v46, %v1443_v42 }
 0x74a   : > { %v1415_v50 = vadd.f32 %v1414_v45, %v1412_v44 }
 0x74b   : > { %v1445_v51 = vadd.f32 %v1444_v49, %v1442_v48 }
 0x74c   : > { %1416 = vadd.xlane.f32.xlu0 %v1415_v50 }
 0x750   : > { %1446 = vadd.xlane.f32.xlu0 %v1445_v51 }
 0x7d9   : > { %v1417_v52 = vpop.xlane.xlu0 %1416 }
 0x7da   : > { %v1418_v53 = vmul.f32 0.002, %v1417_v52 }
 0x7dc   : > { %v1449_v56 = vsel %vm1050_vm7, %v2404_v18, %v1418_v53 }
 0x7dd   : > { %v1447_v54 = vpop.xlane.xlu0 %1446 }
 0x7de   : > { %v1448_v55 = vmul.f32 0.002, %v1447_v54 }
 0x7e0   : > { %v1451_v57 = vsel %vm1450_vm10, %v1449_v56, %v1448_v55 }
 0x7e1   : > { %1452 = vxpose.xlu0.b32.start.end [1/1] (short) (narrow) %v1451_v57, 8 }
 0x80a   : > { %1922 = vset.pattern.permute.xlu0 %v2123_v43 }
 0x861   : > { %v1468_v13 = vpop.trf.xlu0 }
 0x862   : > { %1837 = vmatmul.mubr.msk.f32.vlgmr.msra.gmra.mrb[8].mxu1 %vm711_vm4, %v1468_v13 }
 0x935   : > { %v1553_v58 = vpop.f32.mrb[8].mxu1 }
 0x936   : > { %1558 = vst.msk [vmem:[%s524_s27] sm:$0x7] %vm1557_vm11, %v1553_v58  ;;  %v1838_v4 = vpop.f32.mrb[9].mxu1 }
 0x937 PF: > { %s33_s30 = sadd.s32 1, %s2109_s30  }
 0x938   : > { %p30_p0 = scmp.ge.s32.totalorder %s33_s30, 4  }
 0x93a   :  { %32 = sbr.rel (!%p30_p0) target bundleno = 18 (0x12), region = 133 }
 0x941   :  { %1592 = vsyncpa [#allocation5], 1 }
 0x942   :  { %1594 = vsyncpa [#allocation5 + $0x1], 1 }
 0x943   :  { %1595 = vsyncpa [#allocation7], 1 }
 0x944   :  { %1596 = vsyncpa [#allocation10], 1 }

</bundles_post_ra>
